<compile_context>
chip_gen: v7x
topology: tpu7x:2x2x1
jax: 0.10.0
libtpu: 0.0.40
codegen_flags: <defaults>
</compile_context>

<pallas_src>
import functools

import jax
import jax.numpy as jnp
from jax.experimental import pallas as pl
from jax.experimental.pallas import tpu as pltpu


def _wnet_loss_kernel(seed_ref, lab_ref, coord_ref, emb_ref, inst_ref, out_ref,
                      acc_seg, acc_cnt, acc_x1, acc_y1, acc_x2, acc_y2, acc_pres,
                      *, n_pad, height, width, radius, gamma):
    f32 = jnp.float32
    big = jnp.float32(1e9)
    phase = pl.program_id(1)
    t = pl.program_id(2)
    last_t = pl.num_programs(2) - 1

    NP = n_pad
    TP = inst_ref.shape[1]

    # ---- per-image init (first grid step of each image) ---------------------
    @pl.when((phase == 0) & (t == 0))
    def _init():
        out_ref[...] = jnp.zeros_like(out_ref)
        acc_seg[...] = jnp.zeros_like(acc_seg)
        acc_cnt[...] = jnp.zeros_like(acc_cnt)
        acc_pres[...] = jnp.zeros_like(acc_pres)
        acc_x1[...] = jnp.full_like(acc_x1, big)
        acc_y1[...] = jnp.full_like(acc_y1, big)
        acc_x2[...] = jnp.full_like(acc_x2, -big)
        acc_y2[...] = jnp.full_like(acc_y2, -big)

    # ---- shared per-tile quantities ------------------------------------------
    inst = inst_ref[...]                                        # (1, TP) int32
    ins_iota = jax.lax.broadcasted_iota(jnp.int32, (NP, TP), 0)
    sel = ins_iota == inst                                      # (NP, TP) bool
    xx = coord_ref[0:1, :]                                      # (1, TP) f32 (precomputed, no div/mod)
    yy = coord_ref[1:2, :]                                      # (1, TP) f32
    rows8 = jax.lax.broadcasted_iota(jnp.int32, (8, 128), 0)

    # ========================= phase 0: accumulation ==========================
    @pl.when(phase == 0)
    def _phase0():
        # focal ("seed") loss partial sum on the sublane/lane-dense slab.
        # TODO(synk): FocalLoss('multiclass', 2) internals are not in the spec;
        # standard multiclass focal loss (gamma=2, no alpha, mean overall) is used.
        logits = seed_ref[...]                                  # (NC, TR, 128) f32
        m = jnp.max(logits, axis=0, keepdims=True)              # (1, TR, 128)
        ex = jnp.exp(logits - m)                                # only per-class EUP work
        sumex = jnp.sum(ex, axis=0, keepdims=True)              # (1, TR, 128)
        lab = lab_ref[...]                                      # (TR, 128) int32
        cls_iota = jax.lax.broadcasted_iota(jnp.int32, logits.shape, 0)
        is_tgt = cls_iota == lab[None]
        # select the target-class logit / unnormalized prob first, so the focal
        # weight chain runs on a single (TR, 128) slab instead of NC of them.
        logit_t = jnp.sum(jnp.where(is_tgt, logits, 0.0), axis=0)   # (TR, 128)
        ex_t = jnp.sum(jnp.where(is_tgt, ex, 0.0), axis=0)          # (TR, 128)
        logsm_t = (logit_t - m[0]) - jnp.log(sumex[0])               # log p_t
        pt_t = ex_t / sumex[0]                                       # p_t
        focal_tile = jnp.sum(((1.0 - pt_t) ** gamma) * (-logsm_t))

        # per-instance feature sums and pixel counts
        emb = emb_ref[...]                                      # (C, TP) f32
        onehot = sel.astype(f32)
        acc_seg[...] += jax.lax.dot_general(
            onehot, emb, (((1,), (1,)), ((), ())), preferred_element_type=f32)
        acc_cnt[...] += jnp.sum(onehot, axis=1, keepdims=True)

        # running per-instance bounding boxes
        acc_x1[...] = jnp.minimum(
            acc_x1[...], jnp.min(jnp.where(sel, xx, big), axis=1, keepdims=True))
        acc_y1[...] = jnp.minimum(
            acc_y1[...], jnp.min(jnp.where(sel, yy, big), axis=1, keepdims=True))
        acc_x2[...] = jnp.maximum(
            acc_x2[...], jnp.max(jnp.where(sel, xx, -big), axis=1, keepdims=True))
        acc_y2[...] = jnp.maximum(
            acc_y2[...], jnp.max(jnp.where(sel, yy, -big), axis=1, keepdims=True))

        out_ref[...] += jnp.where(rows8 == 0, focal_tile, 0.0)

    # ================= phase 1: intra / presence, then finalize ================
    @pl.when(phase == 1)
    def _phase1():
        emb = emb_ref[...]                                      # (C, TP) f32
        onehot = sel.astype(f32)

        # per-instance mean "key" features (tiny NPxC recompute from accumulators)
        cnt = acc_cnt[...]                                      # (NP, 1)
        key = acc_seg[...] / jnp.maximum(cnt, 1.0)              # clamp empty rows
        ksq = jnp.sum(key * key, axis=1, keepdims=True)
        key_n = key * jax.lax.rsqrt(jnp.maximum(ksq, 1e-24))    # F.normalize eps=1e-12

        # intra loss: cos(pixel embedding, its instance key); ||key_n|| == 1,
        # so only the pixel-embedding norm is needed in the denominator.
        s_full = jax.lax.dot_general(key_n, emb, (((1,), (0,)), ((), ())),
                                     preferred_element_type=f32)   # (NP, TP)
        dotsel = jnp.sum(jnp.where(sel, s_full, 0.0), axis=0, keepdims=True)
        n2sq = jnp.sum(emb * emb, axis=0, keepdims=True)            # (1, TP)
        cosp = dotsel * jax.lax.rsqrt(jnp.maximum(n2sq, 1e-16))     # eps=1e-8 on norm
        intra_tile = jnp.sum(jnp.exp(1.0 - cosp) - 1.0)
        out_ref[...] += jnp.where(rows8 == 1, intra_tile, 0.0)

        # presence[l, m] += #pixels of instance m inside l's radius-expanded bbox
        r = jnp.float32(radius)
        x1 = acc_x1[...]; y1 = acc_y1[...]; x2 = acc_x2[...]; y2 = acc_y2[...]
        x1e = jnp.where(x1 > r, x1 - r, 0.0)
        x2e = jnp.where(x2 < jnp.float32(width) - r, x2 + r, jnp.float32(width))
        y1e = jnp.where(y1 > r, y1 - r, 0.0)
        y2e = jnp.where(y2 < jnp.float32(height) - r, y2 + r, jnp.float32(height))
        region = ((xx >= x1e) & (xx < x2e) & (yy >= y1e) & (yy < y2e))
        region_bf = region.astype(f32).astype(jnp.bfloat16)     # exact 0/1 in bf16
        onehot_bf = onehot.astype(jnp.bfloat16)
        acc_pres[...] += jax.lax.dot_general(
            region_bf, onehot_bf, (((1,), (1,)), ((), ())),
            preferred_element_type=f32)

        # ---- last tile: inter loss from pairwise key cosines -------------------
        @pl.when(t == last_t)
        def _finalize():
            gram = jax.lax.dot_general(key_n, key_n, (((1,), (1,)), ((), ())),
                                       preferred_element_type=f32)   # (NP, NP)
            inter_mat = jnp.exp(jnp.abs(gram)) - 1.0            # keys are unit norm
            pres = acc_pres[...]
            row_i = jax.lax.broadcasted_iota(jnp.int32, (NP, NP), 0)
            col_i = jax.lax.broadcasted_iota(jnp.int32, (NP, NP), 1)
            # TODO(synk): reference keeps only the 10 largest labels per box
            # (torch.unique top-10); exact for <= 10 non-background neighbors.
            nmask = jnp.where(pres > 0.0, 1.0, 0.0)
            nmask = jnp.where((row_i == 0) | (col_i == 0), 0.5, nmask)
            nmask = jnp.where((row_i == 0) & (col_i == 0), 0.0, nmask)
            # drop labels absent from this image (incl. sublane-padding rows);
            # pres[m, m] == pixel count of m, so the diagonal gives column presence.
            col_cnt = jnp.sum(jnp.where(row_i == col_i, pres, 0.0),
                              axis=0, keepdims=True)            # (1, NP)
            nmask = jnp.where((cnt > 0.0) & (col_cnt > 0.0), nmask, 0.0)
            msum = jnp.sum(nmask)
            loss_inter = jnp.where(msum > 0.0,
                                   jnp.sum(inter_mat * nmask) / msum, 0.0)
            out_ref[...] += jnp.where(rows8 == 2, loss_inter, 0.0)


def _pick_pixel_tile(P, cap):
    """Largest pixel tile dividing P that is a multiple of 1024 (keeps the focal
    slab tile 8-sublane aligned) and <= cap; otherwise the whole image."""
    cand = min(P, cap)
    cand -= cand % 1024
    while cand >= 1024:
        if P % cand == 0:
            return cand
        cand -= 1024
    return P


def w_spatial_emb_loss(seed_maps, labels, emb_maps, instances, n_ins=None,
                       radius=10, w_inst=1.0, w_var=10.0, w_seed=1.0, gamma=2,
                       pixel_tile=8192):
    """seed_maps: (B, NC, H, W) f32, labels: (B, H, W) int,
       emb_maps: (B, C, H, W) f32, instances: (B, 1, H, W) int."""
    B, NC, H, W = seed_maps.shape
    _, C, _, _ = emb_maps.shape
    P = H * W
    assert P % 128 == 0, "H*W must be a multiple of 128"
    if n_ins is None:
        # NOTE: forces a host sync; pass n_ins statically when calling under jit.
        n_ins = int(jax.device_get(jnp.max(instances))) + 1
    NP = max(8, ((int(n_ins) + 7) // 8) * 8)        # pad instance rows to sublanes

    TP = _pick_pixel_tile(P, int(pixel_tile))       # pixel tile (multiple of 128)
    T = P // TP
    TR = TP // 128
    PR = P // 128

    f32 = jnp.float32
    seed_slab = seed_maps.reshape(B, NC, PR, 128).astype(f32)
    lab_slab = labels.reshape(B, PR, 128).astype(jnp.int32)
    emb_f = emb_maps.reshape(B, C, P).astype(f32)
    inst_f = instances.reshape(B, 1, P).astype(jnp.int32)
    pix = jnp.arange(P, dtype=jnp.int32)
    coords = jnp.stack([(pix % W).astype(f32), (pix // W).astype(f32)], axis=0)

    kernel = functools.partial(_wnet_loss_kernel, n_pad=NP, height=H, width=W,
                               radius=radius, gamma=gamma)

    # seed/labels are only read in phase 0; in phase 1 their block index aliases
    # the last phase-0 block so Pallas never re-fetches an unused tile.
    seed_spec = pl.BlockSpec(
        (None, NC, TR, 128),
        lambda b, ph, t: (b, 0, t * (1 - ph) + (T - 1) * ph, 0))
    lab_spec = pl.BlockSpec(
        (None, TR, 128),
        lambda b, ph, t: (b, t * (1 - ph) + (T - 1) * ph, 0))

    out = pl.pallas_call(
        kernel,
        out_shape=jax.ShapeDtypeStruct((B, 8, 128), jnp.float32),
        grid_spec=pltpu.PrefetchScalarGridSpec(
            num_scalar_prefetch=0,
            grid=(B, 2, T),
            in_specs=[
                seed_spec,
                lab_spec,
                pl.BlockSpec((2, TP), lambda b, ph, t: (0, t)),
                pl.BlockSpec((None, C, TP), lambda b, ph, t: (b, 0, t)),
                pl.BlockSpec((None, 1, TP), lambda b, ph, t: (b, 0, t)),
            ],
            out_specs=pl.BlockSpec((None, 8, 128), lambda b, ph, t: (b, 0, 0)),
            scratch_shapes=[
                pltpu.VMEM((NP, C), jnp.float32),    # per-instance feature sums
                pltpu.VMEM((NP, 1), jnp.float32),    # per-instance pixel counts
                pltpu.VMEM((NP, 1), jnp.float32),    # bbox x1 (running min)
                pltpu.VMEM((NP, 1), jnp.float32),    # bbox y1
                pltpu.VMEM((NP, 1), jnp.float32),    # bbox x2 (running max)
                pltpu.VMEM((NP, 1), jnp.float32),    # bbox y2
                pltpu.VMEM((NP, NP), jnp.float32),   # neighbor presence counts
            ]),
        compiler_params=pltpu.CompilerParams(
            dimension_semantics=("parallel", "arbitrary", "arbitrary"),
            vmem_limit_bytes=32 * 1024 * 1024),
    )(seed_slab, lab_slab, coords, emb_f, inst_f)

    focal = jnp.sum(out[:, 0, 0]) / float(B * P)      # mean-reduced focal loss
    loss_intras = jnp.mean(out[:, 1, 0]) / float(P)   # per-image pixel mean, batch mean
    loss_inters = jnp.mean(out[:, 2, 0])
    return focal * w_seed + loss_inters * w_inst + loss_intras * w_var


if __name__ == "__main__":
    key = jax.random.PRNGKey(0)
    B, NC, C, H, W = 2, 2, 16, 64, 64
    N_INS = 4

    k1, k2 = jax.random.split(key)
    seed_maps = jax.random.normal(k1, (B, NC, H, W), jnp.float32)
    emb_maps = jax.random.normal(k2, (B, C, H, W), jnp.float32)

    # deterministic instance maps: 4 quadrant instances per image (labels 0..3 present)
    yy, xx = jnp.meshgrid(jnp.arange(H), jnp.arange(W), indexing="ij")
    base = jnp.zeros((H, W), jnp.int32)
    base = jnp.where((yy < H // 2) & (xx >= W // 2), 1, base)
    base = jnp.where((yy >= H // 2) & (xx < W // 2), 2, base)
    base = jnp.where((yy >= H // 2) & (xx >= W // 2), 3, base)
    instances = jnp.stack([(base + b) % N_INS for b in range(B)],
                          axis=0)[:, None, :, :].astype(jnp.int32)   # (B,1,H,W)
    labels = (instances[:, 0] > 0).astype(jnp.int32)                 # (B,H,W)

    # pixel_tile=1024 forces a multi-tile (T=4) accumulation path at this size.
    loss = w_spatial_emb_loss(seed_maps, labels, emb_maps, instances,
                              n_ins=N_INS, radius=10,
                              w_inst=1.0, w_var=10.0, w_seed=1.0,
                              pixel_tile=1024)
    jax.block_until_ready(loss)
    assert bool(jnp.isfinite(loss)), "loss is not finite"
    print("KERNEL_OK")
</pallas_src>

<mosaic_0001>
module attributes {stable_mosaic.version = 11 : i64} {
  func.func @_wnet_loss_kernel(%arg0: i32, %arg1: i32, %arg2: i32, %arg3: memref<1x2x8x128xf32, #tpu.memory_space<vmem>>, %arg4: memref<1x8x128xi32, #tpu.memory_space<vmem>>, %arg5: memref<2x1024xf32, #tpu.memory_space<vmem>>, %arg6: memref<1x16x1024xf32, #tpu.memory_space<vmem>>, %arg7: memref<1x1x1024xi32, #tpu.memory_space<vmem>>, %arg8: memref<1x8x128xf32, #tpu.memory_space<vmem>>, %arg9: memref<8x16xf32, #tpu.memory_space<vmem>>, %arg10: memref<8x1xf32, #tpu.memory_space<vmem>>, %arg11: memref<8x1xf32, #tpu.memory_space<vmem>>, %arg12: memref<8x1xf32, #tpu.memory_space<vmem>>, %arg13: memref<8x1xf32, #tpu.memory_space<vmem>>, %arg14: memref<8x1xf32, #tpu.memory_space<vmem>>, %arg15: memref<8x8xf32, #tpu.memory_space<vmem>>) attributes {dimension_semantics = [#tpu.dimension_semantics<parallel>, #tpu.dimension_semantics<arbitrary>, #tpu.dimension_semantics<arbitrary>], iteration_bounds = array<i64: 2, 2, 4>, scalar_prefetch = 0 : i64, scratch_operands = 7 : i64, tpu.core_type = #tpu.core_type<tc>, window_params = [{transform_indices = @transform_0, window_bounds = array<i64: 1, 2, 8, 128>}, {transform_indices = @transform_1, window_bounds = array<i64: 1, 8, 128>}, {transform_indices = @transform_2, window_bounds = array<i64: 2, 1024>}, {transform_indices = @transform_3, window_bounds = array<i64: 1, 16, 1024>}, {transform_indices = @transform_4, window_bounds = array<i64: 1, 1, 1024>}, {transform_indices = @transform_5, window_bounds = array<i64: 1, 8, 128>}]} {
    %c0_i32 = arith.constant 0 : i32
    %0 = arith.cmpi eq, %arg1, %c0_i32 : i32
    %c0_i32_0 = arith.constant 0 : i32
    %1 = arith.cmpi eq, %arg2, %c0_i32_0 : i32
    %2 = arith.andi %0, %1 : i1
    %3 = arith.extui %2 : i1 to i32
    %cst = arith.constant 1.000000e+09 : f32
    %c0_i32_1 = arith.constant 0 : i32
    %4 = arith.cmpi ne, %3, %c0_i32_1 : i32
    scf.if %4 {
      %cst_11 = arith.constant 0.000000e+00 : f32
      %19 = vector.broadcast %cst_11 : f32 to vector<8x128xf32>
      %c0_12 = arith.constant 0 : index
      %c0_13 = arith.constant 0 : index
      %c0_14 = arith.constant 0 : index
      %20 = vector.load %arg8[%c0_12, %c0_13, %c0_14] : memref<1x8x128xf32, #tpu.memory_space<vmem>>, vector<1x8x128xf32>
      %21 = vector.shape_cast %20 : vector<1x8x128xf32> to vector<8x128xf32>
      %22 = vector.shape_cast %19 : vector<8x128xf32> to vector<1x8x128xf32>
      tpu.vector_store %arg8[%c0_12, %c0_13, %c0_14], %22 {strides = array<i32>} : memref<1x8x128xf32, #tpu.memory_space<vmem>>, vector<1x8x128xf32>,
      %cst_15 = arith.constant 0.000000e+00 : f32
      %23 = vector.broadcast %cst_15 : f32 to vector<8x16xf32>
      %c0_16 = arith.constant 0 : index
      %c0_17 = arith.constant 0 : index
      %24 = vector.load %arg9[%c0_16, %c0_17] : memref<8x16xf32, #tpu.memory_space<vmem>>, vector<8x16xf32>
      tpu.vector_store %arg9[%c0_16, %c0_17], %23 {strides = array<i32>} : memref<8x16xf32, #tpu.memory_space<vmem>>, vector<8x16xf32>,
      %cst_18 = arith.constant 0.000000e+00 : f32
      %25 = vector.broadcast %cst_18 : f32 to vector<8x1xf32>
      %c0_19 = arith.constant 0 : index
      %c0_20 = arith.constant 0 : index
      %26 = vector.load %arg10[%c0_19, %c0_20] : memref<8x1xf32, #tpu.memory_space<vmem>>, vector<8x1xf32>
      tpu.vector_store %arg10[%c0_19, %c0_20], %25 {strides = array<i32>} : memref<8x1xf32, #tpu.memory_space<vmem>>, vector<8x1xf32>,
      %cst_21 = arith.constant 0.000000e+00 : f32
      %27 = vector.broadcast %cst_21 : f32 to vector<8x8xf32>
      %c0_22 = arith.constant 0 : index
      %c0_23 = arith.constant 0 : index
      %28 = vector.load %arg15[%c0_22, %c0_23] : memref<8x8xf32, #tpu.memory_space<vmem>>, vector<8x8xf32>
      tpu.vector_store %arg15[%c0_22, %c0_23], %27 {strides = array<i32>} : memref<8x8xf32, #tpu.memory_space<vmem>>, vector<8x8xf32>,
      %29 = vector.broadcast %cst : f32 to vector<8x1xf32>
      %c0_24 = arith.constant 0 : index
      %c0_25 = arith.constant 0 : index
      %30 = vector.load %arg11[%c0_24, %c0_25] : memref<8x1xf32, #tpu.memory_space<vmem>>, vector<8x1xf32>
      tpu.vector_store %arg11[%c0_24, %c0_25], %29 {strides = array<i32>} : memref<8x1xf32, #tpu.memory_space<vmem>>, vector<8x1xf32>,
      %31 = vector.broadcast %cst : f32 to vector<8x1xf32>
      %c0_26 = arith.constant 0 : index
      %c0_27 = arith.constant 0 : index
      %32 = vector.load %arg12[%c0_26, %c0_27] : memref<8x1xf32, #tpu.memory_space<vmem>>, vector<8x1xf32>
      tpu.vector_store %arg12[%c0_26, %c0_27], %31 {strides = array<i32>} : memref<8x1xf32, #tpu.memory_space<vmem>>, vector<8x1xf32>,
      %cst_28 = arith.constant 0.000000e+00 : f32
      %33 = arith.subf %cst_28, %cst : f32
      %34 = vector.broadcast %33 : f32 to vector<8x1xf32>
      %c0_29 = arith.constant 0 : index
      %c0_30 = arith.constant 0 : index
      %35 = vector.load %arg13[%c0_29, %c0_30] : memref<8x1xf32, #tpu.memory_space<vmem>>, vector<8x1xf32>
      tpu.vector_store %arg13[%c0_29, %c0_30], %34 {strides = array<i32>} : memref<8x1xf32, #tpu.memory_space<vmem>>, vector<8x1xf32>,
      %cst_31 = arith.constant 0.000000e+00 : f32
      %36 = arith.subf %cst_31, %cst : f32
      %37 = vector.broadcast %36 : f32 to vector<8x1xf32>
      %c0_32 = arith.constant 0 : index
      %c0_33 = arith.constant 0 : index
      %38 = vector.load %arg14[%c0_32, %c0_33] : memref<8x1xf32, #tpu.memory_space<vmem>>, vector<8x1xf32>
      tpu.vector_store %arg14[%c0_32, %c0_33], %37 {strides = array<i32>} : memref<8x1xf32, #tpu.memory_space<vmem>>, vector<8x1xf32>,
    } else {
    }
    %c0 = arith.constant 0 : index
    %c0_2 = arith.constant 0 : index
    %c0_3 = arith.constant 0 : index
    %5 = vector.load %arg7[%c0, %c0_2, %c0_3] : memref<1x1x1024xi32, #tpu.memory_space<vmem>>, vector<1x1x1024xi32>
    %6 = vector.shape_cast %5 : vector<1x1x1024xi32> to vector<1x1024xi32>
    %7 = tpu.iota {dimensions = array<i32: 0>} : vector<8x1024xi32>
    %8 = vector.broadcast %6 : vector<1x1024xi32> to vector<8x1024xi32>
    %9 = arith.cmpi eq, %7, %8 : vector<8x1024xi32>
    %c0_4 = arith.constant 0 : index
    %c0_5 = arith.constant 0 : index
    %10 = vector.load %arg5[%c0_4, %c0_5] : memref<2x1024xf32, #tpu.memory_space<vmem>>, vector<1x1024xf32>
    %c1 = arith.constant 1 : index
    %c0_6 = arith.constant 0 : index
    %11 = vector.load %arg5[%c1, %c0_6] : memref<2x1024xf32, #tpu.memory_space<vmem>>, vector<1x1024xf32>
    %12 = tpu.iota {dimensions = array<i32: 0>} : vector<8x128xi32>
    %c0_i32_7 = arith.constant 0 : i32
    %13 = arith.cmpi eq, %arg1, %c0_i32_7 : i32
    %14 = arith.extui %13 : i1 to i32
    %cst_8 = arith.constant 1.000000e+09 : f32
    %c0_i32_9 = arith.constant 0 : i32
    %15 = arith.cmpi ne, %14, %c0_i32_9 : i32
    scf.if %15 {
      %c0_11 = arith.constant 0 : index
      %c0_12 = arith.constant 0 : index
      %c0_13 = arith.constant 0 : index
      %c0_14 = arith.constant 0 : index
      %19 = vector.load %arg3[%c0_11, %c0_12, %c0_13, %c0_14] : memref<1x2x8x128xf32, #tpu.memory_space<vmem>>, vector<1x2x8x128xf32>
      %20 = vector.shape_cast %19 : vector<1x2x8x128xf32> to vector<2x8x128xf32>
      %cst_15 = arith.constant dense<0xFF800000> : vector<8x128xf32>
      %21 = vector.multi_reduction <maximumf>, %20, %cst_15 [0] : vector<2x8x128xf32> to vector<8x128xf32>
      %22 = vector.shape_cast %21 : vector<8x128xf32> to vector<1x8x128xf32>
      %23 = vector.broadcast %22 : vector<1x8x128xf32> to vector<2x8x128xf32>
      %24 = arith.subf %20, %23 : vector<2x8x128xf32>
      %25 = math.exp %24 : vector<2x8x128xf32>
      %cst_16 = arith.constant dense<0.000000e+00> : vector<8x128xf32>
      %26 = vector.multi_reduction <add>, %25, %cst_16 [0] : vector<2x8x128xf32> to vector<8x128xf32>
      %27 = vector.shape_cast %26 : vector<8x128xf32> to vector<1x8x128xf32>
      %c0_17 = arith.constant 0 : index
      %c0_18 = arith.constant 0 : index
      %c0_19 = arith.constant 0 : index
      %28 = vector.load %arg4[%c0_17, %c0_18, %c0_19] : memref<1x8x128xi32, #tpu.memory_space<vmem>>, vector<1x8x128xi32>
      %29 = vector.shape_cast %28 : vector<1x8x128xi32> to vector<8x128xi32>
      %30 = tpu.iota {dimensions = array<i32: 0>} : vector<2x8x128xi32>
      %31 = vector.shape_cast %29 : vector<8x128xi32> to vector<1x8x128xi32>
      %32 = vector.broadcast %31 : vector<1x8x128xi32> to vector<2x8x128xi32>
      %33 = arith.cmpi eq, %30, %32 : vector<2x8x128xi32>
      %cst_20 = arith.constant 0.000000e+00 : f32
      %34 = vector.broadcast %cst_20 : f32 to vector<2x8x128xf32>
      %35 = arith.select %33, %20, %34 : vector<2x8x128xi1>, vector<2x8x128xf32>
      %cst_21 = arith.constant dense<0.000000e+00> : vector<8x128xf32>
      %36 = vector.multi_reduction <add>, %35, %cst_21 [0] : vector<2x8x128xf32> to vector<8x128xf32>
      %cst_22 = arith.constant 0.000000e+00 : f32
      %37 = vector.broadcast %cst_22 : f32 to vector<2x8x128xf32>
      %38 = arith.select %33, %25, %37 : vector<2x8x128xi1>, vector<2x8x128xf32>
      %cst_23 = arith.constant dense<0.000000e+00> : vector<8x128xf32>
      %39 = vector.multi_reduction <add>, %38, %cst_23 [0] : vector<2x8x128xf32> to vector<8x128xf32>
      %40 = vector.shape_cast %22 : vector<1x8x128xf32> to vector<8x128xf32>
      %41 = arith.subf %36, %40 : vector<8x128xf32>
      %42 = vector.shape_cast %27 : vector<1x8x128xf32> to vector<8x128xf32>
      %43 = math.log %42 : vector<8x128xf32>
      %44 = arith.subf %41, %43 : vector<8x128xf32>
      %45 = vector.shape_cast %27 : vector<1x8x128xf32> to vector<8x128xf32>
      %46 = arith.divf %39, %45 : vector<8x128xf32>
      %cst_24 = arith.constant 1.000000e+00 : f32
      %47 = vector.broadcast %cst_24 : f32 to vector<8x128xf32>
      %48 = arith.subf %47, %46 : vector<8x128xf32>
      %49 = arith.mulf %48, %48 : vector<8x128xf32>
      %cst_25 = arith.constant 0.000000e+00 : f32
      %50 = vector.broadcast %cst_25 : f32 to vector<8x128xf32>
      %51 = arith.subf %50, %44 : vector<8x128xf32>
      %52 = arith.mulf %49, %51 : vector<8x128xf32>
      %53 = vector.shape_cast %52 : vector<8x128xf32> to vector<1x8x128xf32>
      %cst_26 = arith.constant dense<0.000000e+00> : vector<1xf32>
      %54 = vector.multi_reduction <add>, %53, %cst_26 [1, 2] : vector<1x8x128xf32> to vector<1xf32>
      %55 = vector.shape_cast %54 : vector<1xf32> to vector<1x1x1xf32>
      %56 = vector.extract %55[0, 0, 0] : f32 from vector<1x1x1xf32>
      %c0_27 = arith.constant 0 : index
      %c0_28 = arith.constant 0 : index
      %c0_29 = arith.constant 0 : index
      %57 = vector.load %arg6[%c0_27, %c0_28, %c0_29] : memref<1x16x1024xf32, #tpu.memory_space<vmem>>, vector<1x16x1024xf32>
      %58 = vector.shape_cast %57 : vector<1x16x1024xf32> to vector<16x1024xf32>
      %59 = arith.extui %9 : vector<8x1024xi1> to vector<8x1024xi32>
      %60 = arith.sitofp %59 : vector<8x1024xi32> to vector<8x1024xf32>
      %c0_30 = arith.constant 0 : index
      %c0_31 = arith.constant 0 : index
      %61 = vector.load %arg9[%c0_30, %c0_31] : memref<8x16xf32, #tpu.memory_space<vmem>>, vector<8x16xf32>
      %cst_32 = arith.constant dense<0.000000e+00> : vector<8x16xf32>
      %62 = tpu.matmul %60, %58, %cst_32 {dimension_numbers = #tpu.dot_dimension_numbers<[1], [1], [0], [0], [0, 0, 1, 0], [], []>} : vector<8x1024xf32>, vector<16x1024xf32>, vector<8x16xf32> -> vector<8x16xf32>
      %63 = arith.addf %61, %62 : vector<8x16xf32>
      %c0_33 = arith.constant 0 : index
      %c0_34 = arith.constant 0 : index
      %64 = vector.load %arg9[%c0_33, %c0_34] : memref<8x16xf32, #tpu.memory_space<vmem>>, vector<8x16xf32>
      tpu.vector_store %arg9[%c0_33, %c0_34], %63 {strides = array<i32>} : memref<8x16xf32, #tpu.memory_space<vmem>>, vector<8x16xf32>,
      %c0_35 = arith.constant 0 : index
      %c0_36 = arith.constant 0 : index
      %65 = vector.load %arg10[%c0_35, %c0_36] : memref<8x1xf32, #tpu.memory_space<vmem>>, vector<8x1xf32>
      %cst_37 = arith.constant dense<0.000000e+00> : vector<8xf32>
      %66 = vector.multi_reduction <add>, %60, %cst_37 [1] : vector<8x1024xf32> to vector<8xf32>
      %67 = vector.shape_cast %66 : vector<8xf32> to vector<8x1xf32>
      %68 = arith.addf %65, %67 : vector<8x1xf32>
      %c0_38 = arith.constant 0 : index
      %c0_39 = arith.constant 0 : index
      %69 = vector.load %arg10[%c0_38, %c0_39] : memref<8x1xf32, #tpu.memory_space<vmem>>, vector<8x1xf32>
      tpu.vector_store %arg10[%c0_38, %c0_39], %68 {strides = array<i32>} : memref<8x1xf32, #tpu.memory_space<vmem>>, vector<8x1xf32>,
      %c0_40 = arith.constant 0 : index
      %c0_41 = arith.constant 0 : index
      %70 = vector.load %arg11[%c0_40, %c0_41] : memref<8x1xf32, #tpu.memory_space<vmem>>, vector<8x1xf32>
      %71 = vector.shape_cast %10 : vector<1x1024xf32> to vector<1x1024xf32>
      %72 = vector.broadcast %71 : vector<1x1024xf32> to vector<8x1024xf32>
      %73 = vector.broadcast %cst_8 : f32 to vector<8x1024xf32>
      %74 = arith.select %9, %72, %73 : vector<8x1024xi1>, vector<8x1024xf32>
      %cst_42 = arith.constant dense<0x7F800000> : vector<8xf32>
      %75 = vector.multi_reduction <minimumf>, %74, %cst_42 [1] : vector<8x1024xf32> to vector<8xf32>
      %76 = vector.shape_cast %75 : vector<8xf32> to vector<8x1xf32>
      %77 = arith.minimumf %70, %76 : vector<8x1xf32>
      %c0_43 = arith.constant 0 : index
      %c0_44 = arith.constant 0 : index
      %78 = vector.load %arg11[%c0_43, %c0_44] : memref<8x1xf32, #tpu.memory_space<vmem>>, vector<8x1xf32>
      tpu.vector_store %arg11[%c0_43, %c0_44], %77 {strides = array<i32>} : memref<8x1xf32, #tpu.memory_space<vmem>>, vector<8x1xf32>,
      %c0_45 = arith.constant 0 : index
      %c0_46 = arith.constant 0 : index
      %79 = vector.load %arg12[%c0_45, %c0_46] : memref<8x1xf32, #tpu.memory_space<vmem>>, vector<8x1xf32>
      %80 = vector.shape_cast %11 : vector<1x1024xf32> to vector<1x1024xf32>
      %81 = vector.broadcast %80 : vector<1x1024xf32> to vector<8x1024xf32>
      %82 = vector.broadcast %cst_8 : f32 to vector<8x1024xf32>
      %83 = arith.select %9, %81, %82 : vector<8x1024xi1>, vector<8x1024xf32>
      %cst_47 = arith.constant dense<0x7F800000> : vector<8xf32>
      %84 = vector.multi_reduction <minimumf>, %83, %cst_47 [1] : vector<8x1024xf32> to vector<8xf32>
      %85 = vector.shape_cast %84 : vector<8xf32> to vector<8x1xf32>
      %86 = arith.minimumf %79, %85 : vector<8x1xf32>
      %c0_48 = arith.constant 0 : index
      %c0_49 = arith.constant 0 : index
      %87 = vector.load %arg12[%c0_48, %c0_49] : memref<8x1xf32, #tpu.memory_space<vmem>>, vector<8x1xf32>
      tpu.vector_store %arg12[%c0_48, %c0_49], %86 {strides = array<i32>} : memref<8x1xf32, #tpu.memory_space<vmem>>, vector<8x1xf32>,
      %c0_50 = arith.constant 0 : index
      %c0_51 = arith.constant 0 : index
      %88 = vector.load %arg13[%c0_50, %c0_51] : memref<8x1xf32, #tpu.memory_space<vmem>>, vector<8x1xf32>
      %cst_52 = arith.constant 0.000000e+00 : f32
      %89 = arith.subf %cst_52, %cst_8 : f32
      %90 = vector.shape_cast %10 : vector<1x1024xf32> to vector<1x1024xf32>
      %91 = vector.broadcast %90 : vector<1x1024xf32> to vector<8x1024xf32>
      %92 = vector.broadcast %89 : f32 to vector<8x1024xf32>
      %93 = arith.select %9, %91, %92 : vector<8x1024xi1>, vector<8x1024xf32>
      %cst_53 = arith.constant dense<0xFF800000> : vector<8xf32>
      %94 = vector.multi_reduction <maximumf>, %93, %cst_53 [1] : vector<8x1024xf32> to vector<8xf32>
      %95 = vector.shape_cast %94 : vector<8xf32> to vector<8x1xf32>
      %96 = arith.maximumf %88, %95 : vector<8x1xf32>
      %c0_54 = arith.constant 0 : index
      %c0_55 = arith.constant 0 : index
      %97 = vector.load %arg13[%c0_54, %c0_55] : memref<8x1xf32, #tpu.memory_space<vmem>>, vector<8x1xf32>
      tpu.vector_store %arg13[%c0_54, %c0_55], %96 {strides = array<i32>} : memref<8x1xf32, #tpu.memory_space<vmem>>, vector<8x1xf32>,
      %c0_56 = arith.constant 0 : index
      %c0_57 = arith.constant 0 : index
      %98 = vector.load %arg14[%c0_56, %c0_57] : memref<8x1xf32, #tpu.memory_space<vmem>>, vector<8x1xf32>
      %cst_58 = arith.constant 0.000000e+00 : f32
      %99 = arith.subf %cst_58, %cst_8 : f32
      %100 = vector.shape_cast %11 : vector<1x1024xf32> to vector<1x1024xf32>
      %101 = vector.broadcast %100 : vector<1x1024xf32> to vector<8x1024xf32>
      %102 = vector.broadcast %99 : f32 to vector<8x1024xf32>
      %103 = arith.select %9, %101, %102 : vector<8x1024xi1>, vector<8x1024xf32>
      %cst_59 = arith.constant dense<0xFF800000> : vector<8xf32>
      %104 = vector.multi_reduction <maximumf>, %103, %cst_59 [1] : vector<8x1024xf32> to vector<8xf32>
      %105 = vector.shape_cast %104 : vector<8xf32> to vector<8x1xf32>
      %106 = arith.maximumf %98, %105 : vector<8x1xf32>
      %c0_60 = arith.constant 0 : index
      %c0_61 = arith.constant 0 : index
      %107 = vector.load %arg14[%c0_60, %c0_61] : memref<8x1xf32, #tpu.memory_space<vmem>>, vector<8x1xf32>
      tpu.vector_store %arg14[%c0_60, %c0_61], %106 {strides = array<i32>} : memref<8x1xf32, #tpu.memory_space<vmem>>, vector<8x1xf32>,
      %c0_62 = arith.constant 0 : index
      %c0_63 = arith.constant 0 : index
      %c0_64 = arith.constant 0 : index
      %108 = vector.load %arg8[%c0_62, %c0_63, %c0_64] : memref<1x8x128xf32, #tpu.memory_space<vmem>>, vector<1x8x128xf32>
      %109 = vector.shape_cast %108 : vector<1x8x128xf32> to vector<8x128xf32>
      %c0_i32_65 = arith.constant 0 : i32
      %110 = vector.broadcast %c0_i32_65 : i32 to vector<8x128xi32>
      %111 = arith.cmpi eq, %12, %110 : vector<8x128xi32>
      %cst_66 = arith.constant 0.000000e+00 : f32
      %112 = vector.broadcast %56 : f32 to vector<8x128xf32>
      %113 = vector.broadcast %cst_66 : f32 to vector<8x128xf32>
      %114 = arith.select %111, %112, %113 : vector<8x128xi1>, vector<8x128xf32>
      %115 = arith.addf %109, %114 : vector<8x128xf32>
      %c0_67 = arith.constant 0 : index
      %c0_68 = arith.constant 0 : index
      %c0_69 = arith.constant 0 : index
      %116 = vector.load %arg8[%c0_67, %c0_68, %c0_69] : memref<1x8x128xf32, #tpu.memory_space<vmem>>, vector<1x8x128xf32>
      %117 = vector.shape_cast %116 : vector<1x8x128xf32> to vector<8x128xf32>
      %118 = vector.shape_cast %115 : vector<8x128xf32> to vector<1x8x128xf32>
      tpu.vector_store %arg8[%c0_67, %c0_68, %c0_69], %118 {strides = array<i32>} : memref<1x8x128xf32, #tpu.memory_space<vmem>>, vector<1x8x128xf32>,
    } else {
    }
    %c1_i32 = arith.constant 1 : i32
    %16 = arith.cmpi eq, %arg1, %c1_i32 : i32
    %17 = arith.extui %16 : i1 to i32
    %c0_i32_10 = arith.constant 0 : i32
    %18 = arith.cmpi ne, %17, %c0_i32_10 : i32
    scf.if %18 {
      %c0_11 = arith.constant 0 : index
      %c0_12 = arith.constant 0 : index
      %c0_13 = arith.constant 0 : index
      %19 = vector.load %arg6[%c0_11, %c0_12, %c0_13] : memref<1x16x1024xf32, #tpu.memory_space<vmem>>, vector<1x16x1024xf32>
      %20 = vector.shape_cast %19 : vector<1x16x1024xf32> to vector<16x1024xf32>
      %21 = arith.extui %9 : vector<8x1024xi1> to vector<8x1024xi32>
      %22 = arith.sitofp %21 : vector<8x1024xi32> to vector<8x1024xf32>
      %c0_14 = arith.constant 0 : index
      %c0_15 = arith.constant 0 : index
      %23 = vector.load %arg10[%c0_14, %c0_15] : memref<8x1xf32, #tpu.memory_space<vmem>>, vector<8x1xf32>
      %c0_16 = arith.constant 0 : index
      %c0_17 = arith.constant 0 : index
      %24 = vector.load %arg9[%c0_16, %c0_17] : memref<8x16xf32, #tpu.memory_space<vmem>>, vector<8x16xf32>
      %cst_18 = arith.constant 1.000000e+00 : f32
      %25 = vector.broadcast %cst_18 : f32 to vector<8x1xf32>
      %26 = arith.maximumf %23, %25 : vector<8x1xf32>
      %27 = vector.broadcast %26 : vector<8x1xf32> to vector<8x16xf32>
      %28 = arith.divf %24, %27 : vector<8x16xf32>
      %29 = arith.mulf %28, %28 : vector<8x16xf32>
      %cst_19 = arith.constant dense<0.000000e+00> : vector<8xf32>
      %30 = vector.multi_reduction <add>, %29, %cst_19 [1] : vector<8x16xf32> to vector<8xf32>
      %31 = vector.shape_cast %30 : vector<8xf32> to vector<8x1xf32>
      %cst_20 = arith.constant 1.000000e-24 : f32
      %32 = vector.broadcast %cst_20 : f32 to vector<8x1xf32>
      %33 = arith.maximumf %31, %32 : vector<8x1xf32>
      %34 = math.rsqrt %33 : vector<8x1xf32>
      %35 = vector.broadcast %34 : vector<8x1xf32> to vector<8x16xf32>
      %36 = arith.mulf %28, %35 : vector<8x16xf32>
      %cst_21 = arith.constant dense<0.000000e+00> : vector<8x1024xf32>
      %37 = tpu.matmul %36, %20, %cst_21 {dimension_numbers = #tpu.dot_dimension_numbers<[1], [0], [0], [1], [0, 0, 1, 1], [], []>} : vector<8x16xf32>, vector<16x1024xf32>, vector<8x1024xf32> -> vector<8x1024xf32>
      %cst_22 = arith.constant 0.000000e+00 : f32
      %38 = vector.broadcast %cst_22 : f32 to vector<8x1024xf32>
      %39 = arith.select %9, %37, %38 : vector<8x1024xi1>, vector<8x1024xf32>
      %cst_23 = arith.constant dense<0.000000e+00> : vector<1024xf32>
      %40 = vector.multi_reduction <add>, %39, %cst_23 [0] : vector<8x1024xf32> to vector<1024xf32>
      %41 = vector.shape_cast %40 : vector<1024xf32> to vector<1x1024xf32>
      %42 = arith.mulf %20, %20 : vector<16x1024xf32>
      %cst_24 = arith.constant dense<0.000000e+00> : vector<1024xf32>
      %43 = vector.multi_reduction <add>, %42, %cst_24 [0] : vector<16x1024xf32> to vector<1024xf32>
      %44 = vector.shape_cast %43 : vector<1024xf32> to vector<1x1024xf32>
      %cst_25 = arith.constant 1.000000e-16 : f32
      %45 = vector.broadcast %cst_25 : f32 to vector<1x1024xf32>
      %46 = arith.maximumf %44, %45 : vector<1x1024xf32>
      %47 = math.rsqrt %46 : vector<1x1024xf32>
      %48 = arith.mulf %41, %47 : vector<1x1024xf32>
      %cst_26 = arith.constant 1.000000e+00 : f32
      %49 = vector.broadcast %cst_26 : f32 to vector<1x1024xf32>
      %50 = arith.subf %49, %48 : vector<1x1024xf32>
      %51 = math.exp %50 : vector<1x1024xf32>
      %cst_27 = arith.constant 1.000000e+00 : f32
      %52 = vector.broadcast %cst_27 : f32 to vector<1x1024xf32>
      %53 = arith.subf %51, %52 : vector<1x1024xf32>
      %54 = vector.shape_cast %53 : vector<1x1024xf32> to vector<1x1x1024xf32>
      %cst_28 = arith.constant dense<0.000000e+00> : vector<1xf32>
      %55 = vector.multi_reduction <add>, %54, %cst_28 [1, 2] : vector<1x1x1024xf32> to vector<1xf32>
      %56 = vector.shape_cast %55 : vector<1xf32> to vector<1x1x1xf32>
      %57 = vector.extract %56[0, 0, 0] : f32 from vector<1x1x1xf32>
      %c0_29 = arith.constant 0 : index
      %c0_30 = arith.constant 0 : index
      %c0_31 = arith.constant 0 : index
      %58 = vector.load %arg8[%c0_29, %c0_30, %c0_31] : memref<1x8x128xf32, #tpu.memory_space<vmem>>, vector<1x8x128xf32>
      %59 = vector.shape_cast %58 : vector<1x8x128xf32> to vector<8x128xf32>
      %c1_i32_32 = arith.constant 1 : i32
      %60 = vector.broadcast %c1_i32_32 : i32 to vector<8x128xi32>
      %61 = arith.cmpi eq, %12, %60 : vector<8x128xi32>
      %cst_33 = arith.constant 0.000000e+00 : f32
      %62 = vector.broadcast %57 : f32 to vector<8x128xf32>
      %63 = vector.broadcast %cst_33 : f32 to vector<8x128xf32>
      %64 = arith.select %61, %62, %63 : vector<8x128xi1>, vector<8x128xf32>
      %65 = arith.addf %59, %64 : vector<8x128xf32>
      %c0_34 = arith.constant 0 : index
      %c0_35 = arith.constant 0 : index
      %c0_36 = arith.constant 0 : index
      %66 = vector.load %arg8[%c0_34, %c0_35, %c0_36] : memref<1x8x128xf32, #tpu.memory_space<vmem>>, vector<1x8x128xf32>
      %67 = vector.shape_cast %66 : vector<1x8x128xf32> to vector<8x128xf32>
      %68 = vector.shape_cast %65 : vector<8x128xf32> to vector<1x8x128xf32>
      tpu.vector_store %arg8[%c0_34, %c0_35, %c0_36], %68 {strides = array<i32>} : memref<1x8x128xf32, #tpu.memory_space<vmem>>, vector<1x8x128xf32>,
      %c0_37 = arith.constant 0 : index
      %c0_38 = arith.constant 0 : index
      %69 = vector.load %arg11[%c0_37, %c0_38] : memref<8x1xf32, #tpu.memory_space<vmem>>, vector<8x1xf32>
      %c0_39 = arith.constant 0 : index
      %c0_40 = arith.constant 0 : index
      %70 = vector.load %arg12[%c0_39, %c0_40] : memref<8x1xf32, #tpu.memory_space<vmem>>, vector<8x1xf32>
      %c0_41 = arith.constant 0 : index
      %c0_42 = arith.constant 0 : index
      %71 = vector.load %arg13[%c0_41, %c0_42] : memref<8x1xf32, #tpu.memory_space<vmem>>, vector<8x1xf32>
      %c0_43 = arith.constant 0 : index
      %c0_44 = arith.constant 0 : index
      %72 = vector.load %arg14[%c0_43, %c0_44] : memref<8x1xf32, #tpu.memory_space<vmem>>, vector<8x1xf32>
      %cst_45 = arith.constant 1.000000e+01 : f32
      %73 = vector.broadcast %cst_45 : f32 to vector<8x1xf32>
      %74 = arith.cmpf ogt, %69, %73 : vector<8x1xf32>
      %cst_46 = arith.constant 1.000000e+01 : f32
      %75 = vector.broadcast %cst_46 : f32 to vector<8x1xf32>
      %76 = arith.subf %69, %75 : vector<8x1xf32>
      %cst_47 = arith.constant 0.000000e+00 : f32
      %77 = vector.broadcast %cst_47 : f32 to vector<8x1xf32>
      %78 = arith.select %74, %76, %77 : vector<8x1xi1>, vector<8x1xf32>
      %cst_48 = arith.constant 6.400000e+01 : f32
      %cst_49 = arith.constant 1.000000e+01 : f32
      %79 = arith.subf %cst_48, %cst_49 : f32
      %80 = vector.broadcast %79 : f32 to vector<8x1xf32>
      %81 = arith.cmpf olt, %71, %80 : vector<8x1xf32>
      %cst_50 = arith.constant 1.000000e+01 : f32
      %82 = vector.broadcast %cst_50 : f32 to vector<8x1xf32>
      %83 = arith.addf %71, %82 : vector<8x1xf32>
      %cst_51 = arith.constant 6.400000e+01 : f32
      %84 = vector.broadcast %cst_51 : f32 to vector<8x1xf32>
      %85 = arith.select %81, %83, %84 : vector<8x1xi1>, vector<8x1xf32>
      %cst_52 = arith.constant 1.000000e+01 : f32
      %86 = vector.broadcast %cst_52 : f32 to vector<8x1xf32>
      %87 = arith.cmpf ogt, %70, %86 : vector<8x1xf32>
      %cst_53 = arith.constant 1.000000e+01 : f32
      %88 = vector.broadcast %cst_53 : f32 to vector<8x1xf32>
      %89 = arith.subf %70, %88 : vector<8x1xf32>
      %cst_54 = arith.constant 0.000000e+00 : f32
      %90 = vector.broadcast %cst_54 : f32 to vector<8x1xf32>
      %91 = arith.select %87, %89, %90 : vector<8x1xi1>, vector<8x1xf32>
      %cst_55 = arith.constant 6.400000e+01 : f32
      %cst_56 = arith.constant 1.000000e+01 : f32
      %92 = arith.subf %cst_55, %cst_56 : f32
      %93 = vector.broadcast %92 : f32 to vector<8x1xf32>
      %94 = arith.cmpf olt, %72, %93 : vector<8x1xf32>
      %cst_57 = arith.constant 1.000000e+01 : f32
      %95 = vector.broadcast %cst_57 : f32 to vector<8x1xf32>
      %96 = arith.addf %72, %95 : vector<8x1xf32>
      %cst_58 = arith.constant 6.400000e+01 : f32
      %97 = vector.broadcast %cst_58 : f32 to vector<8x1xf32>
      %98 = arith.select %94, %96, %97 : vector<8x1xi1>, vector<8x1xf32>
      %99 = vector.broadcast %10 : vector<1x1024xf32> to vector<8x1024xf32>
      %100 = vector.broadcast %78 : vector<8x1xf32> to vector<8x1024xf32>
      %101 = arith.cmpf oge, %99, %100 : vector<8x1024xf32>
      %102 = vector.broadcast %10 : vector<1x1024xf32> to vector<8x1024xf32>
      %103 = vector.broadcast %85 : vector<8x1xf32> to vector<8x1024xf32>
      %104 = arith.cmpf olt, %102, %103 : vector<8x1024xf32>
      %105 = arith.andi %101, %104 : vector<8x1024xi1>
      %106 = vector.broadcast %11 : vector<1x1024xf32> to vector<8x1024xf32>
      %107 = vector.broadcast %91 : vector<8x1xf32> to vector<8x1024xf32>
      %108 = arith.cmpf oge, %106, %107 : vector<8x1024xf32>
      %109 = arith.andi %105, %108 : vector<8x1024xi1>
      %110 = vector.broadcast %11 : vector<1x1024xf32> to vector<8x1024xf32>
      %111 = vector.broadcast %98 : vector<8x1xf32> to vector<8x1024xf32>
      %112 = arith.cmpf olt, %110, %111 : vector<8x1024xf32>
      %113 = arith.andi %109, %112 : vector<8x1024xi1>
      %114 = arith.extui %113 : vector<8x1024xi1> to vector<8x1024xi32>
      %115 = arith.sitofp %114 : vector<8x1024xi32> to vector<8x1024xf32>
      %116 = arith.truncf %115 : vector<8x1024xf32> to vector<8x1024xbf16>
      %117 = arith.truncf %22 : vector<8x1024xf32> to vector<8x1024xbf16>
      %c0_59 = arith.constant 0 : index
      %c0_60 = arith.constant 0 : index
      %118 = vector.load %arg15[%c0_59, %c0_60] : memref<8x8xf32, #tpu.memory_space<vmem>>, vector<8x8xf32>
      %cst_61 = arith.constant dense<0.000000e+00> : vector<8x8xf32>
      %119 = tpu.matmul %116, %117, %cst_61 {dimension_numbers = #tpu.dot_dimension_numbers<[1], [1], [0], [0], [0, 0, 1, 0], [], []>} : vector<8x1024xbf16>, vector<8x1024xbf16>, vector<8x8xf32> -> vector<8x8xf32>
      %120 = arith.addf %118, %119 : vector<8x8xf32>
      %c0_62 = arith.constant 0 : index
      %c0_63 = arith.constant 0 : index
      %121 = vector.load %arg15[%c0_62, %c0_63] : memref<8x8xf32, #tpu.memory_space<vmem>>, vector<8x8xf32>
      tpu.vector_store %arg15[%c0_62, %c0_63], %120 {strides = array<i32>} : memref<8x8xf32, #tpu.memory_space<vmem>>, vector<8x8xf32>,
      %c3_i32 = arith.constant 3 : i32
      %122 = arith.cmpi eq, %arg2, %c3_i32 : i32
      %123 = arith.extui %122 : i1 to i32
      %c0_i32_64 = arith.constant 0 : i32
      %124 = arith.cmpi ne, %123, %c0_i32_64 : i32
      scf.if %124 {
        %cst_65 = arith.constant dense<0.000000e+00> : vector<8x8xf32>
        %125 = tpu.matmul %36, %36, %cst_65 {dimension_numbers = #tpu.dot_dimension_numbers<[1], [1], [0], [0], [0, 0, 1, 0], [], []>} : vector<8x16xf32>, vector<8x16xf32>, vector<8x8xf32> -> vector<8x8xf32>
        %126 = math.absf %125 : vector<8x8xf32>
        %127 = math.exp %126 : vector<8x8xf32>
        %cst_66 = arith.constant 1.000000e+00 : f32
        %128 = vector.broadcast %cst_66 : f32 to vector<8x8xf32>
        %129 = arith.subf %127, %128 : vector<8x8xf32>
        %c0_67 = arith.constant 0 : index
        %c0_68 = arith.constant 0 : index
        %130 = vector.load %arg15[%c0_67, %c0_68] : memref<8x8xf32, #tpu.memory_space<vmem>>, vector<8x8xf32>
        %131 = tpu.iota {dimensions = array<i32: 0>} : vector<8x8xi32>
        %132 = tpu.iota {dimensions = array<i32: 1>} : vector<8x8xi32>
        %cst_69 = arith.constant 0.000000e+00 : f32
        %133 = vector.broadcast %cst_69 : f32 to vector<8x8xf32>
        %134 = arith.cmpf ogt, %130, %133 : vector<8x8xf32>
        %cst_70 = arith.constant 1.000000e+00 : f32
        %cst_71 = arith.constant 0.000000e+00 : f32
        %135 = vector.broadcast %cst_70 : f32 to vector<8x8xf32>
        %136 = vector.broadcast %cst_71 : f32 to vector<8x8xf32>
        %137 = arith.select %134, %135, %136 : vector<8x8xi1>, vector<8x8xf32>
        %c0_i32_72 = arith.constant 0 : i32
        %138 = vector.broadcast %c0_i32_72 : i32 to vector<8x8xi32>
        %139 = arith.cmpi eq, %131, %138 : vector<8x8xi32>
        %c0_i32_73 = arith.constant 0 : i32
        %140 = vector.broadcast %c0_i32_73 : i32 to vector<8x8xi32>
        %141 = arith.cmpi eq, %132, %140 : vector<8x8xi32>
        %142 = arith.ori %139, %141 : vector<8x8xi1>
        %cst_74 = arith.constant 5.000000e-01 : f32
        %143 = vector.broadcast %cst_74 : f32 to vector<8x8xf32>
        %144 = arith.select %142, %143, %137 : vector<8x8xi1>, vector<8x8xf32>
        %c0_i32_75 = arith.constant 0 : i32
        %145 = vector.broadcast %c0_i32_75 : i32 to vector<8x8xi32>
        %146 = arith.cmpi eq, %131, %145 : vector<8x8xi32>
        %c0_i32_76 = arith.constant 0 : i32
        %147 = vector.broadcast %c0_i32_76 : i32 to vector<8x8xi32>
        %148 = arith.cmpi eq, %132, %147 : vector<8x8xi32>
        %149 = arith.andi %146, %148 : vector<8x8xi1>
        %cst_77 = arith.constant 0.000000e+00 : f32
        %150 = vector.broadcast %cst_77 : f32 to vector<8x8xf32>
        %151 = arith.select %149, %150, %144 : vector<8x8xi1>, vector<8x8xf32>
        %152 = arith.cmpi eq, %131, %132 : vector<8x8xi32>
        %cst_78 = arith.constant 0.000000e+00 : f32
        %153 = vector.broadcast %cst_78 : f32 to vector<8x8xf32>
        %154 = arith.select %152, %130, %153 : vector<8x8xi1>, vector<8x8xf32>
        %cst_79 = arith.constant dense<0.000000e+00> : vector<8xf32>
        %155 = vector.multi_reduction <add>, %154, %cst_79 [0] : vector<8x8xf32> to vector<8xf32>
        %156 = vector.shape_cast %155 : vector<8xf32> to vector<1x8xf32>
        %cst_80 = arith.constant 0.000000e+00 : f32
        %157 = vector.broadcast %cst_80 : f32 to vector<8x1xf32>
        %158 = arith.cmpf ogt, %23, %157 : vector<8x1xf32>
        %cst_81 = arith.constant 0.000000e+00 : f32
        %159 = vector.broadcast %cst_81 : f32 to vector<1x8xf32>
        %160 = arith.cmpf ogt, %156, %159 : vector<1x8xf32>
        %161 = vector.broadcast %158 : vector<8x1xi1> to vector<8x8xi1>
        %162 = vector.broadcast %160 : vector<1x8xi1> to vector<8x8xi1>
        %163 = arith.andi %161, %162 : vector<8x8xi1>
        %cst_82 = arith.constant 0.000000e+00 : f32
        %164 = vector.broadcast %cst_82 : f32 to vector<8x8xf32>
        %165 = arith.select %163, %151, %164 : vector<8x8xi1>, vector<8x8xf32>
        %166 = vector.shape_cast %165 : vector<8x8xf32> to vector<1x8x8xf32>
        %cst_83 = arith.constant dense<0.000000e+00> : vector<1xf32>
        %167 = vector.multi_reduction <add>, %166, %cst_83 [1, 2] : vector<1x8x8xf32> to vector<1xf32>
        %168 = vector.shape_cast %167 : vector<1xf32> to vector<1x1x1xf32>
        %169 = vector.extract %168[0, 0, 0] : f32 from vector<1x1x1xf32>
        %cst_84 = arith.constant 0.000000e+00 : f32
        %170 = arith.cmpf ogt, %169, %cst_84 : f32
        %171 = arith.mulf %129, %165 : vector<8x8xf32>
        %172 = vector.shape_cast %171 : vector<8x8xf32> to vector<1x8x8xf32>
        %cst_85 = arith.constant dense<0.000000e+00> : vector<1xf32>
        %173 = vector.multi_reduction <add>, %172, %cst_85 [1, 2] : vector<1x8x8xf32> to vector<1xf32>
        %174 = vector.shape_cast %173 : vector<1xf32> to vector<1x1x1xf32>
        %175 = vector.extract %174[0, 0, 0] : f32 from vector<1x1x1xf32>
        %176 = arith.divf %175, %169 : f32
        %cst_86 = arith.constant 0.000000e+00 : f32
        %177 = arith.select %170, %176, %cst_86 : f32
        %c0_87 = arith.constant 0 : index
        %c0_88 = arith.constant 0 : index
        %c0_89 = arith.constant 0 : index
        %178 = vector.load %arg8[%c0_87, %c0_88, %c0_89] : memref<1x8x128xf32, #tpu.memory_space<vmem>>, vector<1x8x128xf32>
        %179 = vector.shape_cast %178 : vector<1x8x128xf32> to vector<8x128xf32>
        %c2_i32 = arith.constant 2 : i32
        %180 = vector.broadcast %c2_i32 : i32 to vector<8x128xi32>
        %181 = arith.cmpi eq, %12, %180 : vector<8x128xi32>
        %cst_90 = arith.constant 0.000000e+00 : f32
        %182 = vector.broadcast %177 : f32 to vector<8x128xf32>
        %183 = vector.broadcast %cst_90 : f32 to vector<8x128xf32>
        %184 = arith.select %181, %182, %183 : vector<8x128xi1>, vector<8x128xf32>
        %185 = arith.addf %179, %184 : vector<8x128xf32>
        %c0_91 = arith.constant 0 : index
        %c0_92 = arith.constant 0 : index
        %c0_93 = arith.constant 0 : index
        %186 = vector.load %arg8[%c0_91, %c0_92, %c0_93] : memref<1x8x128xf32, #tpu.memory_space<vmem>>, vector<1x8x128xf32>
        %187 = vector.shape_cast %186 : vector<1x8x128xf32> to vector<8x128xf32>
        %188 = vector.shape_cast %185 : vector<8x128xf32> to vector<1x8x128xf32>
        tpu.vector_store %arg8[%c0_91, %c0_92, %c0_93], %188 {strides = array<i32>} : memref<1x8x128xf32, #tpu.memory_space<vmem>>, vector<1x8x128xf32>,
      } else {
      }
    } else {
    }
    return
  }
  func.func @transform_0(%arg0: i32, %arg1: i32, %arg2: i32) -> (i32, i32, i32, i32) {
    %c1_i32 = arith.constant 1 : i32
    %0 = arith.subi %c1_i32, %arg1 : i32
    %1 = arith.muli %arg2, %0 : i32
    %c3_i32 = arith.constant 3 : i32
    %2 = arith.muli %c3_i32, %arg1 : i32
    %3 = arith.addi %1, %2 : i32
    %c0_i32 = arith.constant 0 : i32
    %c0_i32_0 = arith.constant 0 : i32
    %c0_i32_1 = arith.constant 0 : i32
    return %arg0, %c0_i32, %3, %c0_i32_0 : i32, i32, i32, i32
  }
  func.func @transform_1(%arg0: i32, %arg1: i32, %arg2: i32) -> (i32, i32, i32) {
    %c1_i32 = arith.constant 1 : i32
    %0 = arith.subi %c1_i32, %arg1 : i32
    %1 = arith.muli %arg2, %0 : i32
    %c3_i32 = arith.constant 3 : i32
    %2 = arith.muli %c3_i32, %arg1 : i32
    %3 = arith.addi %1, %2 : i32
    %c0_i32 = arith.constant 0 : i32
    %c0_i32_0 = arith.constant 0 : i32
    return %arg0, %3, %c0_i32 : i32, i32, i32
  }
  func.func @transform_2(%arg0: i32, %arg1: i32, %arg2: i32) -> (i32, i32) {
    %c0_i32 = arith.constant 0 : i32
    %c0_i32_0 = arith.constant 0 : i32
    return %c0_i32, %arg2 : i32, i32
  }
  func.func @transform_3(%arg0: i32, %arg1: i32, %arg2: i32) -> (i32, i32, i32) {
    %c0_i32 = arith.constant 0 : i32
    %c0_i32_0 = arith.constant 0 : i32
    return %arg0, %c0_i32, %arg2 : i32, i32, i32
  }
  func.func @transform_4(%arg0: i32, %arg1: i32, %arg2: i32) -> (i32, i32, i32) {
    %c0_i32 = arith.constant 0 : i32
    %c0_i32_0 = arith.constant 0 : i32
    return %arg0, %c0_i32, %arg2 : i32, i32, i32
  }
  func.func @transform_5(%arg0: i32, %arg1: i32, %arg2: i32) -> (i32, i32, i32) {
    %c0_i32 = arith.constant 0 : i32
    %c0_i32_0 = arith.constant 0 : i32
    %c0_i32_1 = arith.constant 0 : i32
    return %arg0, %c0_i32, %c0_i32_0 : i32, i32, i32
  }
}

</mosaic_0001>

<bundles_post_ra>
// kernel: tpu_custom_call.1
= control target key start
LH: loop header
LB: loop body
LE: loop exit
PB: predicated region body
PF: predicated region fallthrough
CT: control target
= control target key end

     0   :  { %s4249_s0 = inlined_call_operand.hbm [shape: f32[2,2,32,128], index: 0, kind: input, shape index: {}]   ;;  %s4250_s1 = inlined_call_operand.hbm [shape: s32[2,32,128], index: 1, kind: input, shape index: {}]   ;;  %s4251_s2 = inlined_call_operand.hbm [shape: f32[2,4096], index: 2, kind: input, shape index: {}]   ;;  %s4252_s3 = inlined_call_operand.hbm [shape: f32[2,16,4096], index: 3, kind: input, shape index: {}]   ;;  %s4253_s4 = inlined_call_operand.hbm [shape: s32[2,1,4096], index: 4, kind: input, shape index: {}]   ;;  %s4254_s5 = inlined_call_operand.hbm [shape: f32[2,8,128], index: 5, kind: output, shape index: {}]  }
   0x1   :  { %4299 = sst [smem:[#allocation44_spill]] %s4249_s0 }
   0x2   :  { %4300 = sst [smem:[#allocation45_spill]] %s4250_s1 }
   0x3   :  { %4301 = sst [smem:[#allocation46_spill]] %s4251_s2 }
   0x4   :  { %4302 = sst [smem:[#allocation47_spill]] %s4253_s4 }
   0x5   :  { %4303 = sst [smem:[#allocation48_spill]] %s4254_s5 }
   0x6   :  { %10 = vsyncpa [#allocation10], 0 }
   0x7   :  { %12 = vsyncpa [#allocation10 + $0x1], 0 }
   0x8   :  { %13 = vsyncpa [#allocation13], 0 }
   0x9   :  { %15 = vsyncpa [#allocation13 + $0x1], 0 }
   0xa   :  { %16 = vsyncpa [#allocation16], 0 }
   0xb   :  { %18 = vsyncpa [#allocation16 + $0x1], 0 }
   0xc   :  { %19 = vsyncpa [#allocation11], 0 }
   0xd   :  { %21 = vsyncpa [#allocation11 + $0x1], 0  ;;  %s3154_s18 = smov 0   ;;  %s3156_s19 = smov 0  }
   0xe   :  { %s3158_s20 = smov 0   ;;  %s3160_s21 = smov 0  }
   0xf   :  { %s3162_s22 = smov 0   ;;  %s3164_s23 = smov 0  }
  0x10   :  { %s3166_s24 = smov 0   ;;  %s3168_s25 = smov 0  }
  0x11   :  { %s3170_s26 = smov 0   ;;  %s3172_s27 = smov 0  }
  0x12   :  { %s3174_s28 = smov 0   ;;  %s3176_s29 = smov 0  }
  0x13   :  { %s3178_s30 = smov 0   ;;  %s3180_s6 = smov 0  }
  0x14   :  { %s3182_s7 = smov 0   ;;  %s3184_s8 = smov 0  }
  0x15   :  { %s3186_s9 = smov 0   ;;  %s3188_s10 = smov 0  }
  0x16   :  { %s3190_s11 = smov 0  }
  0x17 LB: > { %4304 = sst [smem:[#allocation24_spill]] %s3027_s18  ;;  %s3250_s12 = sadd.s32 4294967295, %s3099_s11   ;;  %s3099_s11 = sphi %s3190_s11, %s27_s11   ;;  %s3095_s10 = sphi %s3188_s10, %s4429_s10   ;;  %s3091_s9 = sphi %s3186_s9, %s4416_s9   ;;  %s3087_s8 = sphi %s3184_s8, %s4428_s8   ;;  %s3083_s7 = sphi %s3182_s7, %s4427_s7   ;;  %s3079_s6 = sphi %s3180_s6, %s4426_s6   ;;  %s3075_s30 = sphi %s3178_s30, %s4425_s30   ;;  %s3071_s29 = sphi %s3176_s29, %s4424_s29   ;;  %s3067_s28 = sphi %s3174_s28, %s4412_s28   ;;  %s3063_s27 = sphi %s3172_s27, %s4411_s27   ;;  %s3059_s26 = sphi %s3170_s26, %s4423_s26   ;;  %s3055_s25 = sphi %s3168_s25, %s4422_s25   ;;  %s3051_s24 = sphi %s3166_s24, %s4421_s24   ;;  %s3047_s23 = sphi %s3164_s23, %s4420_s23   ;;  %s3043_s22 = sphi %s3162_s22, %s4419_s22   ;;  %s3039_s21 = sphi %s3160_s21, %s4408_s21   ;;  %s3035_s20 = sphi %s3158_s20, %s4418_s20   ;;  %s3031_s19 = sphi %s3156_s19, %s4406_s19   ;;  %s3027_s18 = sphi %s3154_s18, %s4405_s18  }
  0x18   : > { %4305 = sst [smem:[#allocation25_spill]] %s3031_s19  ;;  %s39_s14 = sadd.s32 1, %s3087_s8 }
  0x19   : > { %4306 = sst [smem:[#allocation26_spill]] %s3035_s20  ;;  %s42_s15 = sadd.s32 1, %s3091_s9 }
  0x1a   : > { %4307 = sst [smem:[#allocation27_spill]] %s3043_s22  ;;  %p40_p0 = scmp.ge.s32.totalorder %s39_s14, 4 }
  0x1b   : > { %4308 = sst [smem:[#allocation28_spill]] %s3067_s28  ;;  %s46_s16 = sadd.s32 1, %s3095_s10 }
  0x1c   : > { %4309 = sst [smem:[#allocation29_spill]] %s3071_s29  ;;  %s50_s17 = ssub.s32 1, %s3091_s9 }
  0x1d   : > { %4310 = sst [smem:[#allocation30_spill]] %s3075_s30  ;;  %s52_s5 = smul.u32 3, %s3091_s9 }
  0x1e   : > { %4311 = sst [smem:[#allocation31_spill]] %s3079_s6  ;;  %s4431_s14 = smov (%p40_p0, %s39_s14), 0 }
  0x1f   : > { %4312 = sst [smem:[#allocation32_spill]] %s3083_s7  ;;  %s4433_s15 = smov (!%p40_p0, %s42_s15), %s3091_s9 }
  0x20   : > { %4313 = sst [smem:[#allocation33_spill]] %s3091_s9  ;;  %s51_s7 = smul.u32 %s3087_s8, %s50_s17 }
  0x21   : > { %4314 = sst [smem:[#allocation34_spill]] %s4431_s14  ;;  %s63_s30 = sadd.s32 1, %s3071_s29 }
  0x22   : > { %p44_p1 = scmp.ge.s32.totalorder %s4433_s15, 2  ;;  %p70_p2 = scmp.ne.s32.totalorder %s3071_s29, %s3067_s28 }
  0x23   : > { %s3265_s13 = sadd.s32 %s52_s5, %s51_s7  ;;  %p4274_p3 = scmp.eq.s32.totalorder %s3099_s11, 0 }
  0x24   : > { %s4435_s15 = smov (%p44_p1, %s4433_s15), 0  ;;  %s4437_s16 = smov (!%p44_p1, %s46_s16), %s3095_s10 }
  0x25   : > { %4315 = sst [smem:[#allocation35_spill]] %s4435_s15  ;;  %s54_s6 = ssub.s32 1, %s4435_s15 }
  0x26   : > { %s56_s9 = smul.u32 3, %s4435_s15  ;;  %p48_p4 = scmp.ge.s32.totalorder %s4437_s16, 2 }
  0x27   : > { %s55_s17 = smul.u32 %s54_s6, %s4431_s14  ;;  %p3276_p5 = por %p4274_p3, %p70_p2 }
  0x28   : > { %p76_p6 = scmp.ne.s32.totalorder %s3067_s28, %s3063_s27  ;;  %s4439_s16 = smov (%p48_p4, %s4437_s16), 0 }
  0x29   : > { %4317 = sst [smem:[#allocation36_spill]] %s4439_s16  ;;  %s57_s7 = sadd.s32 %s56_s9, %s55_s17 }
  0x2a   : > { %p4262_p7 = scmp.eq.s32.totalorder %s3250_s12, 0  ;;  %s58_s6 = ssub.s32 %s3095_s10, %s4439_s16 }
  0x2b   : > { %s59_s15 = ssub.s32 %s3265_s13, %s57_s7  ;;  %s3296_s27 = ssub.s32 %s3087_s8, %s4431_s14 }
  0x2c   : > { %s60_s4 = sor.u32 %s59_s15, %s58_s6  ;;  %p3290_p8 = por %p4262_p7, %p76_p6 }
  0x2d   : > { %p61_p9 = scmp.eq.s32.totalorder %s60_s4, 0  ;;  %s150_s9 = sor.u32 %s3296_s27, %s58_s6 }
  0x2e   : > { %s4318_s2 = scalar_select %p3290_p8, 1, 0 }
  0x2f   : > { %s3301_s15 = scalar_select %p61_p9, %s3071_s29, %s63_s30  }
  0x30   : > { %4319 = sst [smem:[#allocation37_spill]] %s4318_s2  ;;  %p151_p11 = scmp.eq.s32.totalorder %s150_s9, 0 }
  0x31   : > { %4320 = sst [smem:[#allocation38_spill]] %s3301_s15  ;;  %s153_s17 = sadd.s32 1, %s3047_s23 }
  0x32   : > { %p160_p12 = scmp.ne.s32.totalorder %s3047_s23, %s3043_s22  ;;  %p166_p13 = scmp.ne.s32.totalorder %s3043_s22, %s3039_s21 }
  0x33   : > { %s3309_s4 = scalar_select %p151_p11, %s3047_s23, %s153_s17  }
  0x34   : > { %p3313_p0 = por %p160_p12, %p4274_p3  ;;  %p3319_p1 = por %p166_p13, %p4262_p7 }
  0x35   : > { %4321 = sst [smem:[#allocation39_spill]] %s3309_s4  ;;  %p205_p2 = scmp.eq.s32.totalorder %s58_s6, 0 }
  0x36   : > { %s4323_s16 = scalar_select %p3319_p1, 1, 0 }
  0x37   : > { %s207_s30 = sadd.s32 1, %s3035_s20  ;;  %p217_p4 = scmp.ne.s32.totalorder %s3035_s20, %s3031_s19 }
  0x38   : > { %4324 = sst [smem:[#allocation40_spill]] %s4323_s16  ;;  %p218_p6 = scmp.eq.s32.totalorder %s3250_s12, 15 }
  0x39   : > { %s3328_s21 = scalar_select %p205_p2, %s3035_s20, %s207_s30  }
  0x3a   : > { %p3330_p9 = por %p218_p6, %p217_p4  ;;  %p223_p11 = scmp.ne.s32.totalorder %s3031_s19, %s3027_s18 }
  0x3b   : > { %4325 = sst [smem:[#allocation41_spill]] %s3328_s21  ;;  %s4328_s17 = sadd.s32 4294967294, %s3099_s11  }
  0x3c   : > { %s4326_s9 = scalar_select %p3330_p9, 1, 0 }
  0x3d   : > { %p224_p12 = scmp.eq.s32.totalorder %s4328_s17, 15  ;;  %p4273_p13 = scmp.lt.s32.totalorder %s3099_s11, 16 }
  0x3e   : > { %4327 = sst [smem:[#allocation42_spill]] %s4326_s9  ;;  %s3340_s14 = sand.u32 1, %s3071_s29  }
  0x3f   : > { %p3342_p7 = por %p224_p12, %p223_p11  ;;  %s2334_s30 = sshll.u32 %s3340_s14, 4 }
  0x40   : > { %s2335_s15 = sshll.u32 %s3095_s10, 3  ;;  %s248_s20 = scalar_lea.vmem [#allocation9], %s2334_s30 }
  0x41   : > { %s4329_s6 = scalar_select %p3342_p7, 1, 0 }
  0x42   : > { %s257_s4 = sadd.s32 %s2335_s15, %s3265_s13  ;;  %s260_s18 = sshll.u32 %s248_s20, 4  ;;  %s3354_s18 = int_to_ptr.vmem [resolvable:$true] %s260_s18 }
  0x43   : > { %4330 = sst [smem:[#allocation43_spill]] %s4329_s6  ;;  %s2336_s21 = sshll.u32 %s257_s4, 7 }
  0x44   : > { %s4331_s0 = sld [smem:[#allocation44_spill]]  ;;  %p3360_p2 = pnand %p4273_p13, %p3276_p5 }
  0x45   : > { %s2337_s4 = sshll.u32 %s3340_s14, 3  ;;  %s2338_s19 = sshll.u32 %s3095_s10, 2 }
  0x46   : > { %s274_s30 = scalar_lea.vmem [#allocation12], %s2337_s4  ;;  %s283_s16 = sadd.s32 %s2338_s19, %s3265_s13 }
  0x47   : > { %s287_s20 = sshll.u32 %s274_s30, 4  ;;  %s4333_s1 = sld [smem:[#allocation45_spill]]  ;;  %s3368_s20 = int_to_ptr.vmem [resolvable:$true] %s287_s20 }
  0x48   : > { %p3379_p5 = pnand %p4273_p13, %p3313_p0  ;;  %s4335_s4 = sand.u32 1, %s3099_s11  }
  0x49   : > { %s3385_s19 = scalar_lea.sflag [#allocation13], %s4335_s4  ;;  %p4283_p6 = pneg %p3360_p2 }
  0x4a   : > { %s3352_s29 = scalar_lea.hbm %s4331_s0, %s2336_s21  ;;  %s2339_s21 = sshll.u32 %s283_s16, 7 }
  0x4d   : > { %s3373_s5 = scalar_lea.hbm %s4333_s1, %s2339_s21  ;;  %s2756_s30 = scalar_lea.hbm %s4333_s1, 1024 }
  0x4e   : > { %s2751_s13 = scalar_lea.hbm %s3373_s5, 128  ;;  %p2757_p0 = scmp.lt.u32.totalorder %s3373_s5, %s4333_s1 }
  0x4f   : > { %p2752_p4 = scmp.ne.s32.totalorder %s3373_s5, %s2751_s13  ;;  %p2758_p13 = scmp.lt.u32.totalorder %s2756_s30, %s2751_s13 }
  0x50   : > { %p2760_p10 = scmp.lt.u32.totalorder %s2751_s13, %s3373_s5 }
  0x51   : > { %p2754_p11 = pnand %p4283_p6, %p2752_p4  ;;  %p2759_p3 = por %p2758_p13, %p2757_p0 }
  0x53   : > { %p2755_p12 = pneg %p2754_p11  ;;  %p2761_p7 = por %p2760_p10, %p2759_p3 }
  0x55   : > { %p2762_p9 = pnand %p2761_p7, %p2755_p12 }
  0x57   : > { %2765 = shalt.err (!%p2762_p9)
}
  0x58   : > { %s2766_s17 = scalar_lea.vmem %s3368_s20, 128  ;;  %s3101_s4 = smov [#allocation12]  }
  0x59   : > { %p2767_p4 = scmp.ne.s32.totalorder %s3368_s20, %s2766_s17  ;;  %s2771_s16 = sshll.u32 %s3101_s4, 4  ;;  %s2772_s16 = int_to_ptr.vmem [resolvable:$false] %s2771_s16 }
  0x5a   : > { %s2773_s7 = scalar_lea.vmem %s2772_s16, 256  ;;  %p2774_p8 = scmp.lt.s32.totalorder %s3368_s20, %s2772_s16 }
  0x5b   : > { %p2769_p11 = pnand %p2767_p4, %p4283_p6  ;;  %p2775_p13 = scmp.lt.s32.totalorder %s2773_s7, %s2766_s17 }
  0x5d   : > { %p2770_p1 = pneg %p2769_p11  ;;  %p2776_p0 = por %p2775_p13, %p2774_p8 }
  0x5f   : > { %p2777_p3 = pnand %p2776_p0, %p2770_p1 }
  0x61   : > { %2780 = shalt.err (!%p2777_p3)
}
  0x62   : > { %2515 = dma.hbm_to_vmem [thread:$0]  (!%p3360_p2), %s3373_s5, 128, %s3368_s20, %s3385_s19  }
  0x63   : > { %p2351_p7 = scmp.ge.s32.totalorder %s3099_s11, 1  ;;  %p355_p10 = scmp.lt.s32.totalorder %s3099_s11, 17 }
  0x64   : > { %s4281_s13 = sand.u32 1, %s3047_s23   ;;  %s4284_s21 = sshll.u32 %s3087_s8, 3 }
  0x65   : > { %s2343_s30 = sshll.u32 %s4281_s13, 7  ;;  %p3419_p8 = pnand %p2351_p7, %p355_p10 }
  0x66   : > { %s2345_s17 = sshll.u32 %s3095_s10, 6  ;;  %s317_s4 = scalar_lea.vmem [#allocation15], %s2343_s30 }
  0x67   : > { %s4336_s9 = scalar_select %p3419_p8, 1, 0 }
  0x68   : > { %s326_s16 = sshll.u32 %s317_s4, 4  ;;  %s323_s7 = sadd.s32 %s2345_s17, %s4284_s21  ;;  %s3426_s16 = int_to_ptr.vmem [resolvable:$true] %s326_s16 }
  0x69   : > { %s2346_s20 = sshll.u32 %s323_s7, 7  ;;  %s4337_s2 = sand.u32 1, %s3099_s11  }
  0x6a   : > { %s3431_s22 = scalar_lea.hbm %s4252_s3, %s2346_s20  ;;  %s3435_s13 = scalar_lea.sflag [#allocation16], %s4337_s2 }
  0x6b   : > { %s2781_s28 = scalar_lea.hbm %s3431_s22, 2048  ;;  %p4285_p9 = pneg %p3379_p5 }
  0x6c   : > { %p2782_p1 = scmp.ne.s32.totalorder %s3431_s22, %s2781_s28  ;;  %s2786_s1 = scalar_lea.hbm %s4252_s3, 16384 }
  0x6d   : > { %p2787_p11 = scmp.lt.u32.totalorder %s3431_s22, %s4252_s3  ;;  %p2788_p13 = scmp.lt.u32.totalorder %s2786_s1, %s2781_s28 }
  0x6e   : > { %p2784_p12 = pnand %p4285_p9, %p2782_p1  ;;  %p2790_p3 = scmp.lt.u32.totalorder %s2781_s28, %s3431_s22 }
  0x6f   : > { %p2789_p0 = por %p2788_p13, %p2787_p11 }
  0x70   : > { %p2785_p4 = pneg %p2784_p12 }
  0x71   : > { %p2791_p7 = por %p2790_p3, %p2789_p0 }
  0x73   : > { %p2792_p10 = pnand %p2791_p7, %p2785_p4 }
  0x75   : > { %2795 = shalt.err (!%p2792_p10)
}
  0x76   : > { %s2796_s2 = scalar_lea.vmem %s3426_s16, 2048  ;;  %s3102_s20 = smov [#allocation15]  }
  0x77   : > { %p2797_p1 = scmp.ne.s32.totalorder %s3426_s16, %s2796_s2  ;;  %s2801_s5 = sshll.u32 %s3102_s20, 4  ;;  %s2802_s5 = int_to_ptr.vmem [resolvable:$false] %s2801_s5 }
  0x78   : > { %s2803_s30 = scalar_lea.vmem %s2802_s5, 4096  ;;  %p2804_p8 = scmp.lt.s32.totalorder %s3426_s16, %s2802_s5 }
  0x79   : > { %p2799_p12 = pnand %p2797_p1, %p4285_p9  ;;  %p2805_p11 = scmp.lt.s32.totalorder %s2803_s30, %s2796_s2 }
  0x7b   : > { %p2800_p6 = pneg %p2799_p12  ;;  %p2806_p13 = por %p2805_p11, %p2804_p8 }
  0x7d   : > { %p2807_p0 = pnand %p2806_p13, %p2800_p6 }
  0x7f   : > { %2810 = shalt.err (!%p2807_p0)
}
  0x80   : > { %s3103_s28 = smov 4096   ;;  %s3104_s17 = smov 1024  }
  0x81   : > { %s3105_s1 = smov 64   ;;  %s245_s4 = scalar_lea.sflag [#allocation10], %s3340_s14 }
  0x82   : > { %2521 = dma.hbm_to_vmem [thread:$0]  (!%p3379_p5), %s3431_s22, 2048, %s3426_s16, %s3435_s13, %s3103_s28, %s3104_s17, %s3105_s1  }
  0x83   : > { %s2811_s7 = scalar_lea.hbm %s3352_s29, 256  ;;  %p4338_p6 = pneg %p3360_p2 }
  0x84   : > { %p2812_p8 = scmp.ne.s32.totalorder %s3352_s29, %s2811_s7  ;;  %s2816_s5 = scalar_lea.hbm %s4331_s0, 2048 }
  0x85   : > { %p2817_p7 = scmp.lt.u32.totalorder %s3352_s29, %s4331_s0  ;;  %p2818_p10 = scmp.lt.u32.totalorder %s2816_s5, %s2811_s7 }
  0x86   : > { %p2814_p4 = pnand %p2812_p8, %p4338_p6  ;;  %p2820_p12 = scmp.lt.u32.totalorder %s2811_s7, %s3352_s29 }
  0x87   : > { %p2819_p1 = por %p2818_p10, %p2817_p7 }
  0x88   : > { %p2815_p3 = pneg %p2814_p4 }
  0x89   : > { %p2821_p11 = por %p2820_p12, %p2819_p1 }
  0x8b   : > { %p2822_p13 = pnand %p2821_p11, %p2815_p3 }
  0x8d   : > { %2825 = shalt.err (!%p2822_p13)
}
  0x8e   : > { %s2826_s22 = scalar_lea.vmem %s3354_s18, 256  ;;  %p4339_p8 = pmov %p4338_p6 }
  0x8f   : > { %p2827_p0 = scmp.ne.s32.totalorder %s3354_s18, %s2826_s22  ;;  %s3106_s16 = smov [#allocation9]  }
  0x90   : > { %s2831_s28 = sshll.u32 %s3106_s16, 4  ;;  %s2832_s28 = int_to_ptr.vmem [resolvable:$false] %s2831_s28 }
  0x91   : > { %p2829_p6 = pnand %p2827_p0, %p4339_p8  ;;  %s2833_s21 = scalar_lea.vmem %s2832_s28, 512 }
  0x92   : > { %p2834_p9 = scmp.lt.s32.totalorder %s3354_s18, %s2832_s28  ;;  %p2835_p7 = scmp.lt.s32.totalorder %s2833_s21, %s2826_s22 }
  0x93   : > { %p2830_p4 = pneg %p2829_p6 }
  0x94   : > { %p2836_p10 = por %p2835_p7, %p2834_p9 }
  0x96   : > { %p2837_p1 = pnand %p2836_p10, %p2830_p4 }
  0x98   : > { %2840 = shalt.err (!%p2837_p1)
}
  0x99   : > { %s3107_s17 = smov 512   ;;  %s3108_s1 = smov 128  }
  0x9a   : > { %s3109_s7 = smov 8   ;;  %s125_s2 = sadd.s32 1, %s3059_s26 }
  0x9b   : > { %2512 = dma.hbm_to_vmem [thread:$0]  (!%p3360_p2), %s3352_s29, 256, %s3354_s18, %s245_s4, %s3107_s17, %s3108_s1, %s3109_s7  }
  0x9c   : > { %p132_p9 = scmp.ne.s32.totalorder %s3059_s26, %s3055_s25  ;;  %p4340_p3 = scmp.eq.s32.totalorder %s3296_s27, 0 }
  0x9d   : > { %p4341_p12 = scmp.eq.s32.totalorder %s3099_s11, 0  ;;  %p138_p13 = scmp.ne.s32.totalorder %s3055_s25, %s3051_s24 }
  0x9e   : > { %s3495_s20 = scalar_select %p4340_p3, %s3059_s26, %s125_s2  }
  0x9f   : > { %p134_p11 = por %p132_p9, %p4341_p12  ;;  %s296_s5 = sand.u32 1, %s3059_s26  }
  0xa0   : > { %s2447_s30 = sshll.u32 %s3087_s8, 8  ;;  %p4342_p0 = scmp.eq.s32.totalorder %s3250_s12, 0 }
  0xa1   : > { %s2340_s16 = sshll.u32 %s296_s5, 4  ;;  %s4344_s28 = sld [smem:[#allocation46_spill]] }
  0xa2   : > { %p3505_p8 = por %p138_p13, %p4342_p0  ;;  %s298_s29 = scalar_lea.vmem [#allocation14], %s2340_s16 }
  0xa3   : > { %s306_s27 = sshll.u32 %s298_s29, 4  ;;  %p4346_p2 = scmp.lt.s32.totalorder %s3099_s11, 16  ;;  %s3520_s27 = int_to_ptr.vmem [resolvable:$true] %s306_s27 }
  0xa4   : > { %s4343_s22 = scalar_select %p3505_p8, 1, 0 }
  0xa5   : > { %p3516_p6 = pnand %p4346_p2, %p134_p11  ;;  %s4348_s4 = sand.u32 1, %s3047_s23  }
  0xa6   : > { %s3524_s21 = sshll.u32 %s4348_s4, 3 }
  0xa7   : > { %s4345_s0 = smov %s4344_s28  ;;  %s3512_s18 = scalar_lea.hbm %s4344_s28, %s2447_s30 }
  0xa8   : > { %s2841_s17 = scalar_lea.hbm %s3512_s18, 256  ;;  %p2843_p7 = pneg %p3516_p6 }
  0xa9   : > { %p2842_p4 = scmp.ne.s32.totalorder %s3512_s18, %s2841_s17  ;;  %s2846_s2 = scalar_lea.hbm %s4345_s0, 1024 }
  0xaa   : > { %p2847_p9 = scmp.lt.u32.totalorder %s3512_s18, %s4345_s0  ;;  %p2848_p3 = scmp.lt.u32.totalorder %s2846_s2, %s2841_s17 }
  0xab   : > { %p2844_p10 = pnand %p2843_p7, %p2842_p4  ;;  %p2850_p11 = scmp.lt.u32.totalorder %s2841_s17, %s3512_s18 }
  0xac   : > { %p2849_p12 = por %p2848_p3, %p2847_p9 }
  0xad   : > { %p2845_p1 = pneg %p2844_p10 }
  0xae   : > { %p2851_p13 = por %p2850_p11, %p2849_p12 }
  0xb0   : > { %p2852_p0 = pnand %p2851_p13, %p2845_p1 }
  0xb2   : > { %2855 = shalt.err (!%p2852_p0)
}
  0xb3   : > { %s2856_s16 = scalar_lea.vmem %s3520_s27, 256  ;;  %s3110_s6 = smov [#allocation14]  }
  0xb4   : > { %p2857_p2 = scmp.ne.s32.totalorder %s3520_s27, %s2856_s16  ;;  %s2861_s14 = sshll.u32 %s3110_s6, 4  ;;  %s2862_s14 = int_to_ptr.vmem [resolvable:$false] %s2861_s14 }
  0xb5   : > { %s2863_s28 = scalar_lea.vmem %s2862_s14, 512  ;;  %p2864_p8 = scmp.lt.s32.totalorder %s3520_s27, %s2862_s14 }
  0xb6   : > { %p2859_p4 = pnand %p2857_p2, %p2843_p7  ;;  %p2865_p9 = scmp.lt.s32.totalorder %s2863_s28, %s2856_s16 }
  0xb8   : > { %p2860_p10 = pneg %p2859_p4  ;;  %p2866_p3 = por %p2865_p9, %p2864_p8 }
  0xba   : > { %p2867_p12 = pnand %p2866_p3, %p2860_p10 }
  0xbc   : > { %2870 = shalt.err (!%p2867_p12)
}
  0xbd   : > { %2518 = dma.hbm_to_vmem [thread:$0]  (!%p3516_p6), %s3512_s18, 256, %s3520_s27, %s3385_s19  }
  0xbe   : > { %s2349_s29 = sshll.u32 %s3095_s10, 5  ;;  %s340_s4 = scalar_lea.vmem [#allocation17], %s3524_s21 }
  0xbf   : > { %s350_s17 = sshll.u32 %s340_s4, 4  ;;  %s4349_s1 = sshll.u32 %s3087_s8, 3  ;;  %s3556_s17 = int_to_ptr.vmem [resolvable:$true] %s350_s17 }
  0xc0   : > { %s346_s7 = sadd.s32 %s2349_s29, %s4349_s1  ;;  %s4350_s16 = sld [smem:[#allocation47_spill]] }
  0xc1   : > { %s2350_s2 = sshll.u32 %s346_s7, 4  ;;  %p4351_p7 = pneg %p3379_p5 }
  0xc6   : > { %s348_s24 = scalar_lea.hbm %s4350_s16, %s2350_s2  ;;  %s2876_s18 = scalar_lea.hbm %s4350_s16, 1024 }
  0xc7   : > { %s2871_s6 = scalar_lea.hbm %s348_s24, 128  ;;  %p2877_p6 = scmp.lt.u32.totalorder %s348_s24, %s4350_s16 }
  0xc8   : > { %p2872_p8 = scmp.ne.s32.totalorder %s348_s24, %s2871_s6  ;;  %p2878_p13 = scmp.lt.u32.totalorder %s2876_s18, %s2871_s6 }
  0xc9   : > { %p2880_p2 = scmp.lt.u32.totalorder %s2871_s6, %s348_s24 }
  0xca   : > { %p2874_p1 = pnand %p2872_p8, %p4351_p7  ;;  %p2879_p0 = por %p2878_p13, %p2877_p6 }
  0xcc   : > { %p2875_p11 = pneg %p2874_p1  ;;  %p2881_p4 = por %p2880_p2, %p2879_p0 }
  0xce   : > { %p2882_p10 = pnand %p2881_p4, %p2875_p11 }
  0xd0   : > { %2885 = shalt.err (!%p2882_p10)
}
  0xd1   : > { %s2886_s28 = scalar_lea.vmem %s3556_s17, 128  ;;  %p4352_p3 = pmov %p4351_p7 }
  0xd2   : > { %p2887_p9 = scmp.ne.s32.totalorder %s3556_s17, %s2886_s28  ;;  %s3111_s29 = smov [#allocation17]  }
  0xd3   : > { %s2891_s4 = sshll.u32 %s3111_s29, 4  ;;  %s2892_s4 = int_to_ptr.vmem [resolvable:$false] %s2891_s4 }
  0xd4   : > { %p2889_p12 = pnand %p2887_p9, %p4352_p3  ;;  %s2893_s1 = scalar_lea.vmem %s2892_s4, 256 }
  0xd5   : > { %p2894_p7 = scmp.lt.s32.totalorder %s3556_s17, %s2892_s4  ;;  %p2895_p1 = scmp.lt.s32.totalorder %s2893_s1, %s2886_s28 }
  0xd6   : > { %p2890_p8 = pneg %p2889_p12 }
  0xd7   : > { %p2896_p6 = por %p2895_p1, %p2894_p7 }
  0xd9   : > { %p2897_p13 = pnand %p2896_p6, %p2890_p8 }
  0xdb   : > { %2900 = shalt.err (!%p2897_p13)
}
  0xdc   : > { %2524 = dma.hbm_to_vmem [thread:$0]  (!%p3379_p5), %s348_s24, 128, %s3556_s17, %s3435_s13  }
  0xdd   : > { %p4353_p11 = scmp.ne.s32.totalorder %s4336_s9, 0 }
  0xde   : > { %s4354_s7 = sld [smem:[#allocation28_spill]] (!%p4353_p11)  ;;  %s4355_s2 = sld [smem:[#allocation37_spill]] (!%p4353_p11) }
  0xdf   : > { %359 = sbr.rel (%p4353_p11) target bundleno = 1565 (0x61d), region = 40 }
  0xe4   : > { %s361_s5 = sand.u32 (!%p4353_p11), 1, %s4354_s7   ;;  %p4356_p0 = scmp.ne.s32.totalorder (!%p4353_p11), %s4355_s2, 0 }
  0xe5   : > { %s2352_s30 = sshll.u32 (!%p4353_p11), %s361_s5, 4  ;;  %s362_s6 = scalar_lea.sflag (!%p4353_p11), [#allocation10], %s361_s5 }
  0xe6   : > { %s3583_s14 = scalar_lea.vmem [#allocation9], %s2352_s30 }
  0xe7   : > { %3006 = dma.done.wait (%p4356_p0), %s362_s6, 256  }
  0xe8   : > { %3008 = vsyncadd (%p4356_p0), %s362_s6, 4294967040  ;;  %s370_s15 = sand.u32 1, %s3250_s12   ;;  %s2353_s19 = sshll.u32 %s361_s5, 3 }
  0xe9   : > { %s371_s13 = scalar_lea.sflag [#allocation13], %s370_s15  ;;  %s3590_s17 = scalar_lea.vmem [#allocation12], %s2353_s19 }
  0xea   : > { %3010 = dma.done.wait (%p4356_p0), %s371_s13, 128  }
  0xeb   : > { %3012 = vsyncadd (%p4356_p0), %s371_s13, 4294967168  ;;  %s381_s9 = sand.u32 1, %s3055_s25   ;;  %p4357_p5 = scmp.ne.s32.totalorder %s4343_s22, 0 }
  0xec   : > { %s3597_s24 = sshll.u32 %s381_s9, 4 }
  0xed   : > { %s383_s18 = scalar_lea.vmem [#allocation14], %s3597_s24 }
  0xee   : > { %3014 = dma.done.wait (%p4357_p5), %s371_s13, 256  }
  0xef   : > { %3016 = vsyncadd (%p4357_p5), %s371_s13, 4294967040  ;;  %s4358_s12 = sld [smem:[#allocation27_spill]]  ;;  %s4359_s27 = sld [smem:[#allocation40_spill]] }
  0xf0   : > { %s389_s29 = scalar_lea.sflag [#allocation16], %s370_s15 }
  0xf5   : > { %s390_s21 = sand.u32 1, %s4358_s12   ;;  %p4360_p2 = scmp.ne.s32.totalorder %s4359_s27, 0 }
  0xf6   : > { %s2355_s28 = sshll.u32 %s390_s21, 7 }
  0xf7   : > { %s3605_s4 = scalar_lea.vmem [#allocation15], %s2355_s28 }
  0xf8   : > { %3018 = dma.done.wait (%p4360_p2), %s389_s29, 2176  }
  0xf9   : > { %3020 = vsyncadd (%p4360_p2), %s389_s29, 4294965120  ;;  %s4361_s1 = sld [smem:[#allocation25_spill]]  ;;  %s4362_s7 = sld [smem:[#allocation31_spill]] }
  0xfa   : > { %s4363_s2 = sld [smem:[#allocation30_spill]]  ;;  %s2356_s5 = sshll.u32 %s390_s21, 3 }
  0xfb   : > { %s401_s6 = scalar_lea.vmem [#allocation17], %s2356_s5 }
  0xff   : > { %s445_s30 = sand.u32 1, %s4361_s1   ;;  %p460_p4 = scmp.eq.s32.totalorder %s4362_s7, 0 }
 0x100   : > { %s2357_s22 = sshll.u32 %s445_s30, 3  ;;  %p461_p10 = scmp.eq.s32.totalorder %s4363_s2, 0 }
 0x101   : > { %s3616_s15 = scalar_lea.vmem [#allocation18], %s2357_s22 }
 0x102   : > { %p462_p9 = pnand %p461_p10, %p460_p4 }
 0x103   : > { %vm467_vm0 = vcmask (!%p462_p9), 130048   ;;  %vm469_vm1 = vcmask (!%p462_p9), 7168   ;;  %vm471_vm2 = vcmask (!%p462_p9), 64512   ;;  %v3112_v0 = vmov (!%p462_p9), 0.0  }
 0x104   : > { %465 = sbr.rel (%p462_p9) target bundleno = 267 (0x10b), region = 64  ;;  %466 = vst [vmem:[%s3616_s15] sm:$0xff] (!%p462_p9), %v3112_v0  ;;  %468 = vst.msk [vmem:[#allocation2] sm:$0xff] (!%p462_p9), %vm467_vm0, %v3112_v0  ;;  %v3113_v1 = vmov (!%p462_p9), 1e+09   ;;  %v3114_v2 = vmov (!%p462_p9), -1e+09  }
 0x105   : > { %470 = vst.msk [vmem:[#allocation3] sm:$0xff] (!%p462_p9), %vm469_vm1, %v3112_v0  ;;  %473 = vst.msk [vmem:[#allocation4] sm:$0xff] (!%p462_p9), %vm469_vm1, %v3113_v1 }
 0x106   : > { %472 = vst.msk [vmem:[#allocation8] sm:$0xff] (!%p462_p9), %vm471_vm2, %v3112_v0 }
 0x107   : > { %474 = vst.msk [vmem:[#allocation5] sm:$0xff] (!%p462_p9), %vm469_vm1, %v3113_v1  ;;  %475 = vst.msk [vmem:[#allocation6] sm:$0xff] (!%p462_p9), %vm469_vm1, %v3114_v2 }
 0x108   : > { %476 = vst.msk [vmem:[#allocation7] sm:$0xff] (!%p462_p9), %vm469_vm1, %v3114_v2 }
 0x10b PF: > { %v478_v3 = vlaneseq  ;;  %v3621_v4 = vld [vmem:[%s383_s18] ss:$2 sm:$0xff]  ;;  %v3625_v5 = vld [vmem:[%s383_s18 + $0x1] ss:$2 sm:$0xff]  ;;  %v4364_v24 = vmov 0  ;;  %v4366_v25 = vmov 0 }
 0x10c   : > { %v477_v7 = vld [vmem:[%s401_s6] sm:$0xff]  ;;  %v4368_v26 = vmov 0  ;;  %v4370_v27 = vmov 0  ;;  %v4372_v28 = vmov 0  ;;  %v4374_v29 = vmov 0  ;;  %s4380_s19 = sld [smem:[#allocation31_spill]] }
 0x10d   : > { %v3628_v6 = vshrl.u32 %v478_v3, 7  ;;  %v4376_v30 = vmov 0  ;;  %v4378_v31 = vmov 0 }
 0x10f   : > { %v3631_v8 = vsub.s32 0, %v3628_v6  ;;  %v3634_v9 = vsub.s32 1, %v3628_v6  ;;  %v3637_v10 = vsub.s32 2, %v3628_v6  ;;  %v3640_v11 = vsub.s32 3, %v3628_v6 }
 0x110   : > { %v3643_v12 = vsub.s32 4, %v3628_v6  ;;  %v3646_v13 = vsub.s32 5, %v3628_v6  ;;  %v3649_v14 = vsub.s32 6, %v3628_v6  ;;  %v3652_v15 = vsub.s32 7, %v3628_v6 }
 0x111   : > { %v483_v16 = vrot.slane %v477_v7, %v3631_v8  ;;  %v487_v17 = vrot.slane %v477_v7, %v3634_v9  ;;  %v491_v18 = vrot.slane %v477_v7, %v3637_v10  ;;  %v495_v19 = vrot.slane %v477_v7, %v3640_v11 }
 0x112   : > { %v499_v20 = vrot.slane %v477_v7, %v3643_v12  ;;  %v503_v21 = vrot.slane %v477_v7, %v3646_v13  ;;  %v507_v22 = vrot.slane %v477_v7, %v3649_v14  ;;  %v511_v23 = vrot.slane %v477_v7, %v3652_v15  ;;  %p2359_p3 = scmp.ne.s32.totalorder %s4380_s19, 0 }
 0x113   : > { %vm3663_vm3 = vcmp.eq.s32.totalorder %v3628_v6, %v483_v16  ;;  %vm3668_vm4 = vcmp.eq.s32.totalorder %v3628_v6, %v487_v17  ;;  %vm3673_vm5 = vcmp.eq.s32.totalorder %v3628_v6, %v491_v18  ;;  %vm3678_vm6 = vcmp.eq.s32.totalorder %v3628_v6, %v495_v19  ;;  %v565_v32 = vld [vmem:[%s3605_s4 + $0x8] sm:$0xff] (!%p2359_p3)  ;;  %v564_v34 = vld [vmem:[%s3605_s4] sm:$0xff] (!%p2359_p3)  ;;  %v567_v37 = vld [vmem:[%s3605_s4 + $0x18] sm:$0xff] (!%p2359_p3) }
 0x114   : > { %v4365_v24 = vsel %vm3663_vm3, 4294967295, %v4364_v24  ;;  %v4367_v25 = vsel %vm3668_vm4, 4294967295, %v4366_v25  ;;  %v4369_v26 = vsel %vm3673_vm5, 4294967295, %v4368_v26  ;;  %v4371_v27 = vsel %vm3678_vm6, 4294967295, %v4370_v27  ;;  %525 = sbr.rel (%p2359_p3) target bundleno = 533 (0x215), region = 68  ;;  %v573_v33 = vld [vmem:[%s3605_s4 + $0x48] sm:$0xff] (!%p2359_p3) }
 0x115   : > { %vm3683_vm7 = vcmp.eq.s32.totalorder %v3628_v6, %v499_v20  ;;  %vm3688_vm8 = vcmp.eq.s32.totalorder %v3628_v6, %v503_v21  ;;  %vm3693_vm9 = vcmp.eq.s32.totalorder %v3628_v6, %v507_v22  ;;  %vm3698_vm10 = vcmp.eq.s32.totalorder %v3628_v6, %v511_v23  ;;  %v572_v36 = vld [vmem:[%s3605_s4 + $0x40] sm:$0xff] (!%p2359_p3)  ;;  %v575_v38 = vld [vmem:[%s3605_s4 + $0x58] sm:$0xff] (!%p2359_p3)  ;;  %v566_v44 = vld [vmem:[%s3605_s4 + $0x10] sm:$0xff] (!%p2359_p3) }
 0x116   : > { %v4373_v28 = vsel %vm3683_vm7, 4294967295, %v4372_v28  ;;  %v4375_v29 = vsel %vm3688_vm8, 4294967295, %v4374_v29  ;;  %v4377_v30 = vsel %vm3693_vm9, 4294967295, %v4376_v30  ;;  %v4379_v31 = vsel %vm3698_vm10, 4294967295, %v4378_v31  ;;  %v574_v45 = vld [vmem:[%s3605_s4 + $0x50] sm:$0xff] (!%p2359_p3)  ;;  %v569_v46 = vld [vmem:[%s3605_s4 + $0x28] sm:$0xff] (!%p2359_p3) }
 0x117   : > { %v2455_v35 = vpack.c.bf16 (!%p2359_p3), %v573_v33, %v565_v32  ;;  %v3115_v39 = vmov (!%p2359_p3), 1.0   ;;  %v3717_v40 = vrot.slane (!%p2359_p3), %v3621_v4, %v3631_v8  ;;  %v3721_v41 = vrot.slane (!%p2359_p3), %v3621_v4, %v3634_v9  ;;  %v577_v50 = vld [vmem:[%s3605_s4 + $0x68] sm:$0xff] (!%p2359_p3)  ;;  %v568_v51 = vld [vmem:[%s3605_s4 + $0x20] sm:$0xff] (!%p2359_p3)  ;;  %v571_v57 = vld [vmem:[%s3605_s4 + $0x38] sm:$0xff] (!%p2359_p3) }
 0x118   : > { %2368 = vmatprep.mubr.msk.f32.mxu0 (!%p2359_p3), %vm3668_vm4, %v3115_v39  ;;  %2370 = vmatprep.mubr.msk.f32.mxu1 (!%p2359_p3), %vm3678_vm6, %v3115_v39  ;;  %v2457_v42 = vpack.c.bf16 (!%p2359_p3), %v572_v36, %v564_v34  ;;  %v2459_v43 = vpack.c.bf16 (!%p2359_p3), %v575_v38, %v567_v37  ;;  %v3728_v47 = vrot.slane (!%p2359_p3), %v3621_v4, %v3637_v10  ;;  %v576_v52 = vld [vmem:[%s3605_s4 + $0x60] sm:$0xff] (!%p2359_p3)  ;;  %v579_v58 = vld [vmem:[%s3605_s4 + $0x78] sm:$0xff] (!%p2359_p3)  ;;  %v570_v7 = vld [vmem:[%s3605_s4 + $0x30] sm:$0xff] (!%p2359_p3)  ;;  %vm891_vm13 = vcmask (!%p2359_p3), 7168  }
 0x119   : > { %v3732_v48 = vrot.slane (!%p2359_p3), %v3621_v4, %v3643_v12  ;;  %2456 = vmatprep.subr.bf16.mxu0 (!%p2359_p3), %v2455_v35  ;;  %v2461_v49 = vpack.c.bf16 (!%p2359_p3), %v574_v45, %v566_v44  ;;  %v3739_v53 = vrot.slane (!%p2359_p3), %v3621_v4, %v3640_v11  ;;  %v3743_v54 = vrot.slane (!%p2359_p3), %v3621_v4, %v3646_v13  ;;  %v3756_v61 = vld [vmem:[%s3583_s14] sm:$0xff] (!%p2359_p3)  ;;  %v3759_v62 = vld [vmem:[%s3583_s14 + $0x8] sm:$0xff] (!%p2359_p3) }
 0x11a   : > { %v3747_v55 = vrot.slane (!%p2359_p3), %v3621_v4, %v3649_v14  ;;  %2458 = vmatpush1.bf16.xpose.msra.mxu0 (!%p2359_p3), %v2457_v42  ;;  %2460 = vmatprep.subr.bf16.mxu1 (!%p2359_p3), %v2459_v43  ;;  %v2463_v56 = vpack.c.bf16 (!%p2359_p3), %v577_v50, %v569_v46  ;;  %v3753_v59 = vrot.slane (!%p2359_p3), %v3621_v4, %v3652_v15  ;;  %v935_v63 = vsel (!%p2359_p3), %vm3663_vm3, %v3717_v40, 1e+09  ;;  %v578_v16 = vld [vmem:[%s3605_s4 + $0x70] sm:$0xff] (!%p2359_p3) }
 0x11b   : > { %2462 = vmatpush1.bf16.xpose.msra.mxu1 %v2461_v49  ;;  %v2467_v60 = vpack.c.bf16 %v579_v58, %v571_v57  ;;  %v936_v0 = vsel %vm3668_vm4, %v3721_v41, 1e+09  ;;  %v3769_v1 = vrot.slane %v3625_v5, %v3631_v8  ;;  %v2465_v2 = vpack.c.bf16 %v576_v52, %v568_v51 }
 0x11c   : > { %2464 = vmatprep.subr.bf16.mxu0 %v2463_v56  ;;  %v3775_v17 = vmax.f32 %v3756_v61, %v3759_v62  ;;  %v937_v18 = vsel %vm3673_vm5, %v3728_v47, 1e+09  ;;  %v939_v19 = vsel %vm3683_vm7, %v3732_v48, 1e+09  ;;  %v938_v20 = vsel %vm3678_vm6, %v3739_v53, 1e+09 }
 0x11d   : > { %2468 = vmatprep.subr.bf16.mxu1 %v2467_v60  ;;  %v940_v21 = vsel %vm3688_vm8, %v3743_v54, 1e+09  ;;  %v941_v22 = vsel %vm3693_vm9, %v3747_v55, 1e+09  ;;  %v3794_v23 = vrot.slane %v3625_v5, %v3634_v9  ;;  %v967_v34 = vrot.slane %v3625_v5, %v3637_v10 }
 0x11e   : > { %v529_v32 = vsub.f32 %v3756_v61, %v3775_v17  ;;  %v530_v33 = vsub.f32 %v3759_v62, %v3775_v17  ;;  %v971_v35 = vrot.slane %v3625_v5, %v3640_v11  ;;  %v2469_v36 = vpack.c.bf16 %v578_v16, %v570_v7 }
 0x11f   : > { %v942_v37 = vsel %vm3698_vm10, %v3753_v59, 1e+09  ;;  %v943_v38 = vmin.f32 %v935_v63, %v939_v19  ;;  %v944_v42 = vmin.f32 %v936_v0, %v940_v21  ;;  %v945_v45 = vmin.f32 %v937_v18, %v941_v22 }
 0x120   : > { %v531_v43 = vmul.f32 1.442695, %v529_v32  ;;  %v533_v44 = vmul.f32 1.442695, %v530_v33  ;;  %v946_v46 = vmin.f32 %v938_v20, %v942_v37  ;;  %v975_v50 = vrot.slane %v3625_v5, %v3643_v12 }
 0x121   : > { %2369 = vmatmul.mubr.msk.f32.vlgmr.msra.gmra.mrb[0].mxu0 %vm3663_vm3, %v3115_v39  ;;  %v947_v49 = vmin.f32 %v943_v38, %v944_v42  ;;  %v979_v51 = vrot.slane %v3625_v5, %v3646_v13  ;;  %v983_v56 = vrot.slane %v3625_v5, %v3649_v14  ;;  %v987_v57 = vrot.slane %v3625_v5, %v3652_v15 }
 0x122   : > { %2466 = vmatpush1.bf16.xpose.msra.mxu0 %v2465_v2  ;;  %2371 = vmatmul.mubr.msk.f32.vlgmr.msra.gmra.mrb[0].mxu1 %vm3673_vm5, %v3115_v39  ;;  %2700 = vpow2.f32 %v531_v43  ;;  %v948_v52 = vmin.f32 %v945_v45, %v946_v46  ;;  %v996_v58 = vsel %vm3663_vm3, %v3769_v1, 1e+09  ;;  %v997_v60 = vsel %vm3668_vm4, %v3794_v23, 1e+09 }
 0x123   : > { %2470 = vmatpush1.bf16.xpose.msra.mxu1 %v2469_v36  ;;  %2372 = vmatprep.mubr.msk.f32.mxu0 %vm3688_vm8, %v3115_v39  ;;  %2702 = vpow2.f32 %v533_v44  ;;  %v998_v63 = vsel %vm3673_vm5, %v967_v34, 1e+09  ;;  %v999_v2 = vsel %vm3678_vm6, %v971_v35, 1e+09  ;;  %v1000_v7 = vsel %vm3683_vm7, %v975_v50, 1e+09 }
 0x124   : > { %2374 = vmatprep.mubr.msk.f32.mxu1 %vm3698_vm10, %v3115_v39  ;;  %v949_v0 = vmin.f32 %v947_v49, %v948_v52  ;;  %v1001_v16 = vsel %vm3688_vm8, %v979_v51, 1e+09  ;;  %v1002_v18 = vsel %vm3693_vm9, %v983_v56, 1e+09  ;;  %v1003_v19 = vsel %vm3698_vm10, %v987_v57, 1e+09 }
 0x125   : > { %v1004_v20 = vmin.f32 %v996_v58, %v1000_v7  ;;  %v1005_v21 = vmin.f32 %v997_v60, %v1001_v16  ;;  %v1006_v22 = vmin.f32 %v998_v63, %v1002_v18  ;;  %v1007_v32 = vmin.f32 %v999_v2, %v1003_v19  ;;  %v536_v63 = vld [vmem:[%s3590_s17] sm:$0xff] }
 0x126   : > { %950 = vmin.xlane.f32.xlu1 %v949_v0  ;;  %v3116_v37 = vmov 0.0   ;;  %v1036_v43 = vsel %vm3663_vm3, %v3769_v1, -1e+09  ;;  %v1037_v44 = vsel %vm3668_vm4, %v3794_v23, -1e+09  ;;  %vm537_vm11 = vcmp.eq.s32.totalorder %v536_v63, 0 }
 0x127   : > { %v1008_v33 = vmin.f32 %v1004_v20, %v1005_v21  ;;  %v1009_v36 = vmin.f32 %v1006_v22, %v1007_v32  ;;  %v2360_v38 = vsel %vm3663_vm3, 1.0, %v3116_v37  ;;  %v2361_v42 = vsel %vm3668_vm4, 1.0, %v3116_v37 }
 0x128   : > { %v1038_v45 = vsel %vm3673_vm5, %v967_v34, -1e+09  ;;  %v1039_v49 = vsel %vm3678_vm6, %v971_v35, -1e+09  ;;  %v1040_v52 = vsel %vm3683_vm7, %v975_v50, -1e+09 }
 0x129   : > { %2373 = vmatmul.mubr.msk.f32.vlgmr.msra.gmra.mrb[2].mxu0 %vm3683_vm7, %v3115_v39  ;;  %v1010_v46 = vmin.f32 %v1008_v33, %v1009_v36  ;;  %v1041_v1 = vsel %vm3688_vm8, %v979_v51, -1e+09  ;;  %v1042_v23 = vsel %vm3693_vm9, %v983_v56, -1e+09  ;;  %v1043_v34 = vsel %vm3698_vm10, %v987_v57, -1e+09 }
 0x12a   : > { %2375 = vmatmul.mubr.msk.f32.vlgmr.msra.gmra.mrb[2].mxu1 %vm3693_vm9, %v3115_v39  ;;  %v1044_v58 = vmax.f32 %v1036_v43, %v1040_v52  ;;  %v881_v39 = vadd.f32 %v2361_v42, %v2360_v38  ;;  %v1045_v0 = vmax.f32 %v1037_v44, %v1041_v1  ;;  %v1046_v2 = vmax.f32 %v1038_v45, %v1042_v23 }
 0x12b   : > { %1011 = vmin.xlane.f32.xlu1 %v1010_v46  ;;  %v1047_v35 = vmax.f32 %v1039_v49, %v1043_v34  ;;  %v2362_v50 = vsel %vm3673_vm5, 1.0, %v3116_v37  ;;  %vm538_vm12 = vcmp.eq.s32.totalorder %v536_v63, 1  ;;  %v2363_v19 = vsel %vm3678_vm6, 1.0, %v3116_v37 }
 0x12c   : > { %v2701_v60 = vpop.eup %2700  ;;  %v1048_v16 = vmax.f32 %v1044_v58, %v1045_v0  ;;  %v882_v56 = vadd.f32 %v2362_v50, %v881_v39  ;;  %v539_v20 = vsel %vm537_vm11, %v3756_v61, 0.0  ;;  %v540_v21 = vsel %vm538_vm12, %v3759_v62, 0.0 }
 0x12d   : > { %v2703_v7 = vpop.eup %2702  ;;  %v1049_v18 = vmax.f32 %v1046_v2, %v1047_v35  ;;  %v541_v32 = vadd.f32 %v540_v21, %v539_v20  ;;  %v542_v33 = vsel %vm537_vm11, %v2701_v60, 0.0  ;;  %v2364_v38 = vsel %vm3683_vm7, 1.0, %v3116_v37  ;;  %v954_v20 = vld [vmem:[#allocation5] sm:$0xff] }
 0x12e   : > { %v535_v51 = vadd.f32 %v2703_v7, %v2701_v60  ;;  %v883_v22 = vadd.f32 %v2363_v19, %v882_v56  ;;  %v543_v36 = vsel %vm538_vm12, %v2703_v7, 0.0  ;;  %v2365_v45 = vsel %vm3688_vm8, 1.0, %v3116_v37 }
 0x12f   : > { %v1050_v57 = vmax.f32 %v1048_v16, %v1049_v18  ;;  %v544_v42 = vadd.f32 %v543_v36, %v542_v33  ;;  %v545_v44 = vsub.f32 %v541_v32, %v3775_v17  ;;  %v2366_v62 = vsel %vm3693_vm9, 1.0, %v3116_v37 }
 0x130   : > { %2704 = vlog2.f32 %v535_v51  ;;  %v884_v43 = vadd.f32 %v2364_v38, %v883_v22  ;;  %v1016_v46 = vsel %vm3663_vm3, %v3717_v40, -1e+09  ;;  %v1017_v1 = vsel %vm3668_vm4, %v3721_v41, -1e+09 }
 0x131   : > { %2706 = vrcp.f32 %v535_v51  ;;  %1051 = vmax.xlane.f32.xlu1 %v1050_v57  ;;  %v1018_v17 = vsel %vm3673_vm5, %v3728_v47, -1e+09  ;;  %v1020_v58 = vsel %vm3683_vm7, %v3732_v48, -1e+09  ;;  %v1021_v40 = vsel %vm3688_vm8, %v3743_v54, -1e+09 }
 0x132   : > { %v885_v34 = vadd.f32 %v2365_v45, %v884_v43  ;;  %v1019_v63 = vsel %vm3678_vm6, %v3739_v53, -1e+09  ;;  %v1022_v41 = vsel %vm3693_vm9, %v3747_v55, -1e+09  ;;  %v1023_v47 = vsel %vm3698_vm10, %v3753_v59, -1e+09 }
 0x133   : > { %v1024_v48 = vmax.f32 %v1016_v46, %v1020_v58  ;;  %v1025_v2 = vmax.f32 %v1017_v1, %v1021_v40  ;;  %v1026_v54 = vmax.f32 %v1018_v17, %v1022_v41  ;;  %v1027_v50 = vmax.f32 %v1019_v63, %v1023_v47  ;;  %v893_v59 = vld [vmem:[#allocation4] sm:$0xff] }
 0x134   : > { %v886_v7 = vadd.f32 %v2366_v62, %v885_v34  ;;  %v2367_v53 = vsel %vm3698_vm10, 1.0, %v3116_v37  ;;  %v1035_v37 = vld [vmem:[#allocation7] sm:$0xff]  ;;  %v1015_v62 = vld [vmem:[#allocation6] sm:$0xff]  ;;  %vm878_vm14 = vcmask 130048   ;;  %vm1056_vm15 = vcmp.eq.s32.totalorder %v3628_v6, 0 }
 0x135   : > { %v1028_v55 = vmax.f32 %v1024_v48, %v1025_v2  ;;  %v1029_v18 = vmax.f32 %v1026_v54, %v1027_v50 }
 0x136   : > { %v887_v16 = vadd.f32 %v2367_v53, %v886_v7  ;;  %v1055_v7 = vld [vmem:[%s3616_s15] sm:$0xff] }
 0x137   : > { %v1030_v56 = vmax.f32 %v1028_v55, %v1029_v18 }
 0x13a   : > { %v2705_v61 = vpop.eup %2704 }
 0x13b   : > { %v2707_v49 = vpop.eup %2706  ;;  %v547_v52 = vmul.f32 0.6931472, %v2705_v61 }
 0x13c   : > { %v550_v23 = vmul.f32 %v2707_v49, %v544_v42  ;;  %v880_v42 = vld [vmem:[#allocation3] sm:$0xff] }
 0x13d   : > { %v548_v60 = vsub.f32 %v545_v44, %v547_v52 }
 0x13e   : > { %v551_v39 = vsub.f32 1.0, %v550_v23 }
 0x13f   : > { %v553_v0 = vsub.f32 0.0, %v548_v60 }
 0x140   : > { %v552_v35 = vmul.f32 %v551_v39, %v551_v39 }
 0x142   : > { %v554_v51 = vmul.f32 %v553_v0, %v552_v35  ;;  %v596_v0 = vld [vmem:[#allocation2] sm:$0xff] }
 0x144   : > { %555 = vadd.xlane.f32.xlu0 %v554_v51 }
 0x148   : > { %888 = vadd.xlane.f32.xlu0 %v887_v16 }
 0x14c   : > { %1031 = vmax.xlane.f32.xlu0 %v1030_v56 }
 0x1b3   : > { %v951_v57 = vpop.xlane.xlu1 %950 }
 0x1b4   : > { %v952_v19 = vmin.f32 %v893_v59, %v951_v57 }
 0x1b6   : > { %953 = vst.msk [vmem:[#allocation4] sm:$0xff] %vm891_vm13, %v952_v19 }
 0x1b8   : > { %v1012_v21 = vpop.xlane.xlu1 %1011 }
 0x1b9   : > { %v1013_v22 = vmin.f32 %v954_v20, %v1012_v21 }
 0x1bb   : > { %1014 = vst.msk [vmem:[#allocation5] sm:$0xff] %vm891_vm13, %v1013_v22 }
 0x1be   : > { %v1052_v32 = vpop.xlane.xlu1 %1051 }
 0x1bf   : > { %v1053_v33 = vmax.f32 %v1035_v37, %v1052_v32 }
 0x1c1   : > { %1054 = vst.msk [vmem:[#allocation7] sm:$0xff] %vm891_vm13, %v1053_v33 }
 0x1d1   : > { %v556_v36 = vpop.xlane.xlu0 %555 }
 0x1d2   : > { %v557_v38 = vrot.slane %v556_v36, 4 }
 0x1d4   : > { %v558_v43 = vadd.f32 %v557_v38, %v556_v36 }
 0x1d5   : > { %v889_v44 = vpop.xlane.xlu0 %888 }
 0x1d6   : > { %v559_v45 = vrot.slane %v558_v43, 2  ;;  %v890_v61 = vadd.f32 %v889_v44, %v880_v42 }
 0x1d8   : > { %v560_v46 = vadd.f32 %v559_v45, %v558_v43  ;;  %892 = vst.msk [vmem:[#allocation3] sm:$0xff] %vm891_vm13, %v890_v61 }
 0x1d9   : > { %v1032_v49 = vpop.xlane.xlu0 %1031 }
 0x1da   : > { %v561_v52 = vrot.slane %v560_v46, 1  ;;  %v1033_v1 = vmax.f32 %v1015_v62, %v1032_v49 }
 0x1dc   : > { %v562_v17 = vadd.f32 %v561_v52, %v560_v46  ;;  %1034 = vst.msk [vmem:[#allocation6] sm:$0xff] %vm891_vm13, %v1033_v1 }
 0x1de   : > { %2487 = vpush %v562_v17 }
 0x1f4   : > { %v663_v23 = vpop.f32.mrb[0].mxu0 }
 0x1f5   : > { %v665_v34 = vpop.f32.mrb[1].mxu0  ;;  %v733_v58 = vpop.f32.mrb[0].mxu1 }
 0x1f6   : > { %v734_v40 = vadd.f32 %v733_v58, %v663_v23  ;;  %v735_v60 = vpop.f32.mrb[1].mxu1 }
 0x1fc   : > { %v803_v63 = vpop.f32.mrb[2].mxu0 }
 0x1fd   : > { %v804_v41 = vadd.f32 %v803_v63, %v734_v40  ;;  %v873_v47 = vpop.f32.mrb[2].mxu1  ;;  %v805_v39 = vpop.f32.mrb[3].mxu0 }
 0x1fe   : > { %v875_v48 = vpop.f32.mrb[3].mxu1 }
 0x1ff   : > { %v874_v2 = vadd.f32 %v873_v47, %v804_v41 }
 0x201   : > { %v877_v35 = vadd.f32 %v874_v2, %v596_v0 }
 0x203   : > { %879 = vst.msk [vmem:[#allocation2] sm:$0xff] %vm878_vm14, %v877_v35 }
 0x20f   : > { %s2488_s14 = spop %2487 }
 0x210   : > { %v1057_v54 = vstv %s2488_s14 }
 0x211   : > { %v1058_v50 = vsel %vm1056_vm15, %v1057_v54, 0.0 }
 0x212   : > { %v1059_v53 = vadd.f32 %v1058_v50, %v1055_v7 }
 0x214   : > { %1060 = vst [vmem:[%s3616_s15] sm:$0xff] %v1059_v53 }
 0x215 PF: > { %s4381_s13 = sld [smem:[#allocation31_spill]] }
 0x21b   : > { %p2376_p12 = scmp.ne.s32.totalorder %s4381_s13, 1 }
 0x21c   : > { %v3930_v51 = vld [vmem:[#allocation3] sm:$0xff] (!%p2376_p12)  ;;  %v3117_v16 = vmov (!%p2376_p12), 0   ;;  %v1082_v56 = vld [vmem:[#allocation2] sm:$0xff] (!%p2376_p12)  ;;  %vm4287_vm0 = vcmask (!%p2376_p12), 130048   ;;  %v1066_v21 = vld [vmem:[%s3605_s4 + $0x8] sm:$0xff] (!%p2376_p12)  ;;  %v3118_v45 = vmov (!%p2376_p12), 0.0  }
 0x21d   : > { %1064 = sbr.rel (%p2376_p12) target bundleno = 1538 (0x602), region = 72  ;;  %2708 = vset.pattern.permute.xlu0 (!%p2376_p12), %v3117_v16  ;;  %v1083_v55 = vmax.f32 (!%p2376_p12), %v3930_v51, 1.0  ;;  %2709 = vset.pattern.permute.xlu1 (!%p2376_p12), %v3117_v16  ;;  %v1074_v22 = vld [vmem:[%s3605_s4 + $0x48] sm:$0xff] (!%p2376_p12)  ;;  %v1068_v37 = vld [vmem:[%s3605_s4 + $0x18] sm:$0xff] (!%p2376_p12)  ;;  %v1443_v33 = vmul.f32 (!%p2376_p12), %v1066_v21, %v1066_v21  ;;  %v1065_v43 = vld [vmem:[%s3605_s4] sm:$0xff] (!%p2376_p12)  ;;  %s4393_s9 = sld [smem:[#allocation30_spill]] (!%p2376_p12) }
 0x21e   : > { %v2471_v32 = vpack.c.bf16 (!%p2376_p12), %v1074_v22, %v1066_v21  ;;  %v1451_v36 = vmul.f32 (!%p2376_p12), %v1074_v22, %v1074_v22  ;;  %v1076_v38 = vld [vmem:[%s3605_s4 + $0x58] sm:$0xff] (!%p2376_p12)  ;;  %v1445_v42 = vmul.f32 (!%p2376_p12), %v1068_v37, %v1068_v37  ;;  %v1073_v44 = vld [vmem:[%s3605_s4 + $0x40] sm:$0xff] (!%p2376_p12)  ;;  %1166 = vmatprep.mubr.f32.mxu0 (!%p2376_p12), %v3118_v45  ;;  %v1442_v49 = vmul.f32 (!%p2376_p12), %v1065_v43, %v1065_v43  ;;  %v1067_v52 = vld [vmem:[%s3605_s4 + $0x10] sm:$0xff] (!%p2376_p12) }
 0x21f   : > { %1086 = vperm.xlu0 (!%p2376_p12), %2708, %v1083_v55   ;;  %v2475_v61 = vpack.c.bf16 (!%p2376_p12), %v1076_v38, %v1068_v37  ;;  %v1453_v62 = vmul.f32 (!%p2376_p12), %v1076_v38, %v1076_v38  ;;  %v2473_v46 = vpack.c.bf16 (!%p2376_p12), %v1073_v44, %v1065_v43  ;;  %v1075_v1 = vld [vmem:[%s3605_s4 + $0x50] sm:$0xff] (!%p2376_p12)  ;;  %1237 = vmatprep.mubr.f32.mxu1 (!%p2376_p12), %v3118_v45  ;;  %v1070_v47 = vld [vmem:[%s3605_s4 + $0x28] sm:$0xff] (!%p2376_p12)  ;;  %v1072_v0 = vld [vmem:[%s3605_s4 + $0x38] sm:$0xff] (!%p2376_p12) }
 0x220   : > { %2472 = vmatprep.subr.bf16.mxu0 (!%p2376_p12), %v2471_v32  ;;  %v3948_v17 = vadd.f32 (!%p2376_p12), %v1451_v36, %v1443_v33  ;;  %v1450_v23 = vmul.f32 (!%p2376_p12), %v1073_v44, %v1073_v44  ;;  %v2477_v34 = vpack.c.bf16 (!%p2376_p12), %v1075_v1, %v1067_v52  ;;  %v1444_v58 = vmul.f32 (!%p2376_p12), %v1067_v52, %v1067_v52  ;;  %v1078_v39 = vld [vmem:[%s3605_s4 + $0x68] sm:$0xff] (!%p2376_p12)  ;;  %v1080_v2 = vld [vmem:[%s3605_s4 + $0x78] sm:$0xff] (!%p2376_p12)  ;;  %v1069_v16 = vld [vmem:[%s3605_s4 + $0x20] sm:$0xff] (!%p2376_p12) }
 0x221   : > { %2476 = vmatprep.subr.bf16.mxu1 (!%p2376_p12), %v2475_v61  ;;  %v3950_v40 = vadd.f32 (!%p2376_p12), %v1453_v62, %v1445_v42  ;;  %2474 = vmatpush1.bf16.msra.mxu0 (!%p2376_p12), %v2473_v46  ;;  %v1452_v60 = vmul.f32 (!%p2376_p12), %v1075_v1, %v1075_v1  ;;  %v2479_v48 = vpack.c.bf16 (!%p2376_p12), %v1078_v39, %v1070_v47  ;;  %v1071_v21 = vld [vmem:[%s3605_s4 + $0x30] sm:$0xff] (!%p2376_p12)  ;;  %v1601_v22 = vld [vmem:[#allocation4] sm:$0xff] (!%p2376_p12)  ;;  %v1603_v33 = vld [vmem:[#allocation6] sm:$0xff] (!%p2376_p12) }
 0x222   : > { %v3952_v63 = vadd.f32 (!%p2376_p12), %v1450_v23, %v1442_v49  ;;  %2478 = vmatpush1.bf16.msra.mxu1 (!%p2376_p12), %v2477_v34  ;;  %v2483_v35 = vpack.c.bf16 (!%p2376_p12), %v1080_v2, %v1072_v0  ;;  %v1447_v7 = vmul.f32 (!%p2376_p12), %v1070_v47, %v1070_v47  ;;  %v1455_v54 = vmul.f32 (!%p2376_p12), %v1078_v39, %v1078_v39  ;;  %v1079_v32 = vld [vmem:[%s3605_s4 + $0x70] sm:$0xff] (!%p2376_p12)  ;;  %v1604_v49 = vld [vmem:[#allocation7] sm:$0xff] (!%p2376_p12)  ;;  %vm2407_vm13 = vmpackc.low (!%p2376_p12), %vm3668_vm4, %vm3668_vm4 }
 0x223   : > { %v3954_v41 = vadd.f32 (!%p2376_p12), %v1452_v60, %v1444_v58  ;;  %2480 = vmatprep.subr.bf16.mxu0 (!%p2376_p12), %v2479_v48  ;;  %v1449_v50 = vmul.f32 (!%p2376_p12), %v1072_v0, %v1072_v0  ;;  %v1457_v53 = vmul.f32 (!%p2376_p12), %v1080_v2, %v1080_v2  ;;  %v1448_v37 = vmul.f32 (!%p2376_p12), %v1071_v21, %v1071_v21  ;;  %v1602_v44 = vld [vmem:[#allocation5] sm:$0xff] (!%p2376_p12)  ;;  %vm2415_vm14 = vmpackc.low (!%p2376_p12), %vm3678_vm6, %vm3678_vm6  ;;  %p2439_p8 = scmp.ne.s32.totalorder (!%p2376_p12), %s4393_s9, 3 }
 0x224   : > { %2484 = vmatprep.subr.bf16.mxu1 %v2483_v35  ;;  %v3961_v55 = vadd.f32 %v1455_v54, %v1447_v7  ;;  %v1456_v36 = vmul.f32 %v1079_v32, %v1079_v32  ;;  %vm1605_vm1 = vcmp.gt.f32.partialorder %v1601_v22, 10.0  ;;  %v2389_v38 = vadd.f32 -10.0, %v1601_v22  ;;  %vm2409_vm15 = vmpackc.low %vm3663_vm3, %vm3663_vm3 }
 0x225   : > { %vm1608_vm2 = vcmp.lt.f32.partialorder %v1603_v33, 54.0  ;;  %v1609_v43 = vadd.f32 10.0, %v1603_v33  ;;  %v2390_v46 = vadd.f32 -10.0, %v1602_v44  ;;  %vm1611_vm11 = vcmp.gt.f32.partialorder %v1602_v44, 10.0 }
 0x226   : > { %v3970_v42 = vadd.f32 %v1456_v36, %v1448_v37  ;;  %v1607_v61 = vsel %vm1605_vm1, %v2389_v38, 0.0  ;;  %v1615_v1 = vadd.f32 10.0, %v1604_v49  ;;  %vm1614_vm12 = vcmp.lt.f32.partialorder %v1604_v49, 54.0  ;;  %vm2417_vm1 = vmpackc.low %vm3673_vm5, %vm3673_vm5 }
 0x227   : > { %1660 = vperm.xlu1 %2709, %v1607_v61   ;;  %v1610_v62 = vsel %vm1608_vm2, %v1609_v43, 64.0  ;;  %v1613_v52 = vsel %vm1611_vm11, %v2390_v46, 0.0  ;;  %v2485_v39 = vpack.c.bf16 %v1079_v32, %v1071_v21  ;;  %v1633_v7 = vrot.slane %v3621_v4, %v3640_v11 }
 0x228   : > { %v1616_v23 = vsel %vm1614_vm12, %v1615_v1, 64.0  ;;  %v1700_v54 = vrot.slane %v3625_v5, %v3634_v9  ;;  %v1645_v21 = vrot.slane %v3621_v4, %v3649_v14  ;;  %v1473_v22 = vrot.slane %v3954_v41, 4 }
 0x229   : > { %v1494_v32 = vrot.slane %v3961_v55, 4  ;;  %v1501_v46 = vrot.slane %v3970_v42, 4 }
 0x22a   : > { %v1474_v43 = vadd.f32 %v1473_v22, %v3954_v41 }
 0x22b   : > { %1673 = vperm.xlu1 %2709, %v1610_v62   ;;  %v1495_v62 = vadd.f32 %v1494_v32, %v3961_v55 }
 0x22c   : > { %v1475_v1 = vrot.slane %v1474_v43, 2 }
 0x22f   : > { %1735 = vperm.xlu1 %2709, %v1613_v52  }
 0x233   : > { %1756 = vperm.xlu1 %2709, %v1616_v23  }
 0x29e   : > { %v1087_v18 = vpop.permute.xlu0 %1086 }
 0x29f   : > { %2710 = vrcp.f32 %v1087_v18  ;;  %v1077_v18 = vld [vmem:[%s3605_s4 + $0x60] sm:$0xff] }
 0x2a0   : > { %v2481_v47 = vpack.c.bf16 %v1077_v18, %v1069_v16 }
 0x2a6   : > { %v3993_v48 = vpop.permute.xlu1 %1660 }
 0x2a9   : > { %v2711_v59 = vpop.eup %2710 }
 0x2aa   : > { %v3933_v57 = vmul.f32 %v2711_v59, %v1082_v56  ;;  %v1446_v56 = vmul.f32 %v1069_v16, %v1069_v16  ;;  %v3964_v59 = vadd.f32 %v1457_v53, %v1449_v50  ;;  %v3995_v2 = vpop.permute.xlu1 %1673  ;;  %v1708_v50 = vrot.slane %v3625_v5, %v3640_v11 }
 0x2ab   : > { %v1696_v11 = vrot.slane %v3625_v5, %v3631_v8  ;;  %v1629_v16 = vrot.slane %v3621_v4, %v3637_v10 }
 0x2ac   : > { %v1091_v19 = vmul.f32 %v3933_v57, %v3933_v57  ;;  %v1508_v36 = vrot.slane %v3964_v59, 4 }
 0x2ae   : > { %v1093_v20 = vsel %vm4287_vm0, %v1091_v19, 0.0  ;;  %v1454_v19 = vmul.f32 %v1077_v18, %v1077_v18  ;;  %v3997_v35 = vpop.permute.xlu1 %1735  ;;  %v1716_v18 = vrot.slane %v3625_v5, %v3646_v13 }
 0x2af   : > { %1094 = vadd.xlane.f32.xlu0 %v1093_v20  ;;  %vm1741_vm4 = vcmp.ge.f32.partialorder %v1708_v50, %v3997_v35 }
 0x2b0   : > { %v3966_v20 = vadd.f32 %v1454_v19, %v1446_v56  ;;  %v1724_v56 = vrot.slane %v3625_v5, %v3652_v15  ;;  %v1637_v19 = vrot.slane %v3621_v4, %v3643_v12 }
 0x2b2   : > { %v4017_v53 = vpop.permute.xlu1 %1756  ;;  %v1487_v44 = vrot.slane %v3966_v20, 4 }
 0x2b3   : > { %vm1759_vm9 = vcmp.lt.f32.partialorder %v1696_v11, %v4017_v53 }
 0x33c   : > { %v1095_v34 = vpop.xlane.xlu0 %1094 }
 0x33d   : > { %v1096_v58 = vmax.f32 %v1095_v34, 1e-24  ;;  %v1496_v34 = vrot.slane %v1495_v62, 2 }
 0x33f   : > { %2712 = vrsqrt.f32 %v1096_v58  ;;  %v1497_v55 = vadd.f32 %v1496_v34, %v1495_v62 }
 0x349   : > { %v2713_v60 = vpop.eup %2712 }
 0x34a   : > { %v3973_v0 = vmul.f32 %v2713_v60, %v3933_v57  ;;  %v3119_v57 = vmov 1.0|1.0  }
 0x34c   : > { %2377 = vmatmul.mubr.msk.f32.vlgmr.msra.gmra.mrb[0].mxu0 %vm4287_vm0, %v3973_v0  ;;  %2378 = vmatmul.mubr.msk.f32.vlgmr.msra.gmra.mrb[0].mxu1 %vm4287_vm0, %v3973_v0 }
 0x34d   : > { %2482 = vmatpush1.bf16.msra.mxu0 %v2481_v47  ;;  %2486 = vmatpush1.bf16.msra.mxu1 %v2485_v39  ;;  %v1476_v47 = vadd.f32 %v1475_v1, %v1474_v43 }
 0x34e   : > { %1308 = vmatprep.mubr.f32.mxu0 %v3118_v45  ;;  %1379 = vmatprep.mubr.f32.mxu1 %v3118_v45  ;;  %v1625_v45 = vrot.slane %v3621_v4, %v3634_v9  ;;  %v1621_v9 = vrot.slane %v3621_v4, %v3631_v8  ;;  %v1704_v8 = vrot.slane %v3625_v5, %v3637_v10 }
 0x34f   : > { %2408 = vmatprep.subr.msk.bf16.mxu0 %vm2407_vm13, %v3119_v57  ;;  %2416 = vmatprep.subr.msk.bf16.mxu1 %vm2415_vm14, %v3119_v57  ;;  %vm1739_vm13 = vcmp.ge.f32.partialorder %v1700_v54, %v3997_v35  ;;  %v1641_v10 = vrot.slane %v3621_v4, %v3646_v13  ;;  %v1649_v13 = vrot.slane %v3621_v4, %v3652_v15  ;;  %v1466_v4 = vrot.slane %v3948_v17, 4 }
 0x350   : > { %2379 = vmatmul.mubr.msk.f32.vlgmr.msra.gmra.mrb[2].mxu0 %vm4287_vm0, %v3973_v0  ;;  %2380 = vmatmul.mubr.msk.f32.vlgmr.msra.gmra.mrb[2].mxu1 %vm4287_vm0, %v3973_v0  ;;  %vm1664_vm2 = vcmp.ge.f32.partialorder %v1625_v45, %v3993_v48  ;;  %vm1677_vm11 = vcmp.lt.f32.partialorder %v1625_v45, %v3995_v2  ;;  %vm1679_vm0 = vcmp.lt.f32.partialorder %v1633_v7, %v3995_v2 }
 0x351   : > { %vm1685_vm12 = vmand %vm1664_vm2, %vm1677_vm11  ;;  %vm1762_vm2 = vcmp.lt.f32.partialorder %v1708_v50, %v4017_v53  ;;  %vm1676_vm3 = vcmp.lt.f32.partialorder %v1621_v9, %v3995_v2  ;;  %vm1740_vm7 = vcmp.ge.f32.partialorder %v1704_v8, %v3997_v35  ;;  %v1712_v15 = vrot.slane %v3625_v5, %v3643_v12 }
 0x352   : > { %vm1747_vm14 = vmand %vm1685_vm12, %vm1739_vm13  ;;  %vm1663_vm13 = vcmp.ge.f32.partialorder %v1621_v9, %v3993_v48  ;;  %v1720_v12 = vrot.slane %v3625_v5, %v3649_v14  ;;  %v1480_v5 = vrot.slane %v3950_v40, 4  ;;  %v1459_v14 = vrot.slane %v3952_v63, 4 }
 0x353   : > { %v1467_v37 = vadd.f32 %v1466_v4, %v3948_v17  ;;  %v1509_v17 = vadd.f32 %v1508_v36, %v3964_v59  ;;  %v1477_v59 = vrot.slane %v1476_v47, 1  ;;  %v1498_v50 = vrot.slane %v1497_v55, 1 }
 0x354   : > { %v1481_v33 = vadd.f32 %v1480_v5, %v3950_v40  ;;  %v1460_v38 = vadd.f32 %v1459_v14, %v3952_v63  ;;  %v1488_v40 = vadd.f32 %v1487_v44, %v3966_v20  ;;  %v1502_v63 = vadd.f32 %v1501_v46, %v3970_v42 }
 0x355   : > { %v1468_v61 = vrot.slane %v1467_v37, 2  ;;  %v1510_v41 = vrot.slane %v1509_v17, 2  ;;  %v1478_v42 = vadd.f32 %v1477_v59, %v1476_v47 }
 0x356   : > { %2410 = vmatpush1.bf16.xpose.msk.msra.mxu0 %vm2409_vm15, %v3119_v57  ;;  %2418 = vmatpush1.bf16.xpose.msk.msra.mxu1 %vm2417_vm1, %v3119_v57  ;;  %vm1760_vm15 = vcmp.lt.f32.partialorder %v1700_v54, %v4017_v53  ;;  %vm1666_vm1 = vcmp.ge.f32.partialorder %v1633_v7, %v3993_v48  ;;  %v1482_v49 = vrot.slane %v1481_v33, 2  ;;  %v1461_v52 = vrot.slane %v1460_v38, 2 }
 0x357   : > { %vm1768_vm6 = vmand %vm1747_vm14, %vm1760_vm15  ;;  %vm1738_vm15 = vcmp.ge.f32.partialorder %v1696_v11, %v3997_v35  ;;  %v1469_v23 = vadd.f32 %v1468_v61, %v1467_v37  ;;  %v1489_v39 = vrot.slane %v1488_v40, 2 }
 0x358   : > { %vm2411_vm5 = vmpackc.low %vm1768_vm6, %vm1768_vm6  ;;  %v1483_v58 = vadd.f32 %v1482_v49, %v1481_v33  ;;  %v1462_v60 = vadd.f32 %v1461_v52, %v1460_v38 }
 0x359   : > { %2412 = vmatprep.mubr.msk.bf16.mxu0 %vm2411_vm5, %v3119_v57  ;;  %vm1687_vm11 = vmand %vm1666_vm1, %vm1679_vm0  ;;  %vm1665_vm0 = vcmp.ge.f32.partialorder %v1629_v16, %v3993_v48  ;;  %vm1678_vm1 = vcmp.lt.f32.partialorder %v1629_v16, %v3995_v2  ;;  %v1490_v7 = vadd.f32 %v1489_v39, %v1488_v40 }
 0x35a   : > { %vm1749_vm12 = vmand %vm1687_vm11, %vm1741_vm4  ;;  %v1463_v45 = vrot.slane %v1462_v60, 1 }
 0x35b   : > { %vm1770_vm14 = vmand %vm1749_vm12, %vm1762_vm2  ;;  %vm1761_vm12 = vcmp.lt.f32.partialorder %v1704_v8, %v4017_v53  ;;  %v1491_v16 = vrot.slane %v1490_v7, 1 }
 0x35c   : > { %vm2419_vm6 = vmpackc.low %vm1770_vm14, %vm1770_vm14  ;;  %v1464_v11 = vadd.f32 %v1463_v45, %v1462_v60 }
 0x35d   : > { %2420 = vmatprep.mubr.msk.bf16.mxu1 %vm2419_vm6, %v3119_v57  ;;  %vm1684_vm5 = vmand %vm1663_vm13, %vm1676_vm3  ;;  %vm4382_vm13 = vnez %v4379_v31 }
 0x35e   : > { %vm1746_vm4 = vmand %vm1684_vm5, %vm1738_vm15  ;;  %vm1681_vm15 = vcmp.lt.f32.partialorder %v1641_v10, %v3995_v2  ;;  %vm4383_vm5 = vnez %v4373_v28 }
 0x35f   : > { %vm1767_vm11 = vmand %vm1746_vm4, %vm1759_vm9 }
 0x360   : > { %vm2413_vm2 = vmpackc.low %vm1767_vm11, %vm1767_vm11 }
 0x361   : > { %2414 = vmatmul.mubr.msk.bf16.vlgmr.msra.gmra.mrb[4].mxu0 %vm2413_vm2, %v3119_v57  ;;  %vm1686_vm10 = vmand %vm1665_vm0, %vm1678_vm1  ;;  %vm1743_vm0 = vcmp.ge.f32.partialorder %v1716_v18, %v3997_v35  ;;  %vm4384_vm1 = vnez %v4377_v30  ;;  %vm1764_vm2 = vcmp.lt.f32.partialorder %v1716_v18, %v4017_v53 }
 0x362   : > { %vm1748_vm14 = vmand %vm1686_vm10, %vm1740_vm7  ;;  %vm1668_vm10 = vcmp.ge.f32.partialorder %v1641_v10, %v3993_v48  ;;  %v1499_v10 = vadd.f32 %v1498_v50, %v1497_v55 }
 0x363   : > { %vm1769_vm6 = vmand %vm1748_vm14, %vm1761_vm12 }
 0x364   : > { %vm2421_vm3 = vmpackc.low %vm1769_vm6, %vm1769_vm6  ;;  %vm1670_vm6 = vcmp.ge.f32.partialorder %v1649_v13, %v3993_v48 }
 0x365   : > { %2422 = vmatmul.mubr.msk.bf16.vlgmr.msra.gmra.mrb[4].mxu1 %vm2421_vm3, %v3119_v57  ;;  %vm2423_vm9 = vmpackc.low %vm3688_vm8, %vm3688_vm8  ;;  %vm1683_vm3 = vcmp.lt.f32.partialorder %v1649_v13, %v3995_v2  ;;  %vm1744_vm8 = vcmp.ge.f32.partialorder %v1720_v12, %v3997_v35 }
 0x366   : > { %2424 = vmatprep.subr.msk.bf16.mxu0 %vm2423_vm9, %v3119_v57  ;;  %vm2431_vm7 = vmpackc.low %vm4382_vm13, %vm4382_vm13  ;;  %vm1766_vm13 = vcmp.lt.f32.partialorder %v1724_v56, %v4017_v53 }
 0x367   : > { %2432 = vmatprep.subr.msk.bf16.mxu1 %vm2431_vm7, %v3119_v57  ;;  %vm2425_vm4 = vmpackc.low %vm4383_vm5, %vm4383_vm5  ;;  %vm1745_vm7 = vcmp.ge.f32.partialorder %v1724_v56, %v3997_v35 }
 0x368   : > { %2426 = vmatpush1.bf16.xpose.msk.msra.mxu0 %vm2425_vm4, %v3119_v57  ;;  %vm2433_vm11 = vmpackc.low %vm4384_vm1, %vm4384_vm1 }
 0x369   : > { %2434 = vmatpush1.bf16.xpose.msk.msra.mxu1 %vm2433_vm11, %v3119_v57  ;;  %vm1689_vm12 = vmand %vm1668_vm10, %vm1681_vm15  ;;  %vm1680_vm11 = vcmp.lt.f32.partialorder %v1637_v19, %v3995_v2 }
 0x36a   : > { %vm1751_vm14 = vmand %vm1689_vm12, %vm1743_vm0  ;;  %vm1667_vm0 = vcmp.ge.f32.partialorder %v1637_v19, %v3993_v48  ;;  %vm1742_vm12 = vcmp.ge.f32.partialorder %v1712_v15, %v3997_v35  ;;  %v1511_v35 = vadd.f32 %v1510_v41, %v1509_v17  ;;  %v1514_v19 = vmax.f32 %v1464_v11, 1e-16 }
 0x36b   : > { %vm1772_vm9 = vmand %vm1751_vm14, %vm1764_vm2 }
 0x36c   : > { %vm2427_vm4 = vmpackc.low %vm1772_vm9, %vm1772_vm9  ;;  %vm1763_vm9 = vcmp.lt.f32.partialorder %v1712_v15, %v4017_v53  ;;  %v1512_v9 = vrot.slane %v1511_v35, 1  ;;  %v1516_v15 = vmax.f32 %v1478_v42, 1e-16 }
 0x36d   : > { %2428 = vmatprep.mubr.msk.bf16.mxu0 %vm2427_vm4, %v3119_v57  ;;  %vm1691_vm10 = vmand %vm1670_vm6, %vm1683_vm3  ;;  %vm1682_vm4 = vcmp.lt.f32.partialorder %v1645_v21, %v3995_v2  ;;  %v1484_v2 = vrot.slane %v1483_v58, 1 }
 0x36e   : > { %vm1753_vm15 = vmand %vm1691_vm10, %vm1745_vm7  ;;  %vm1669_vm7 = vcmp.ge.f32.partialorder %v1645_v21, %v3993_v48  ;;  %v1503_v48 = vrot.slane %v1502_v63, 2  ;;  %v1513_v56 = vadd.f32 %v1512_v9, %v1511_v35  ;;  %v1492_v21 = vadd.f32 %v1491_v16, %v1490_v7 }
 0x36f   : > { %vm1774_vm2 = vmand %vm1753_vm15, %vm1766_vm13  ;;  %vm1765_vm15 = vcmp.lt.f32.partialorder %v1720_v12, %v4017_v53  ;;  %v1485_v53 = vadd.f32 %v1484_v2, %v1483_v58  ;;  %v1519_v12 = vmax.f32 %v1499_v10, 1e-16 }
 0x370   : > { %vm2435_vm14 = vmpackc.low %vm1774_vm2, %vm1774_vm2  ;;  %v1504_v20 = vadd.f32 %v1503_v48, %v1502_v63  ;;  %v1521_v5 = vmax.f32 %v1513_v56, 1e-16  ;;  %v1518_v14 = vmax.f32 %v1492_v21, 1e-16 }
 0x371   : > { %2436 = vmatprep.mubr.msk.bf16.mxu1 %vm2435_vm14, %v3119_v57  ;;  %vm1688_vm6 = vmand %vm1667_vm0, %vm1680_vm11  ;;  %v1517_v13 = vmax.f32 %v1485_v53, 1e-16  ;;  %vm4388_vm0 = vnez %v4371_v27  ;;  %vm4389_vm11 = vnez %v4373_v28 }
 0x372   : > { %vm1750_vm3 = vmand %vm1688_vm6, %vm1742_vm12  ;;  %v1505_v18 = vrot.slane %v1504_v20, 1  ;;  %vm4390_vm12 = vnez %v4377_v30  ;;  %vm4392_vm6 = vnez %v4379_v31 }
 0x373   : > { %vm1771_vm10 = vmand %vm1750_vm3, %vm1763_vm9  ;;  %vm4391_vm9 = vnez %v4375_v29  ;;  %vm1570_vm3 = vcmask 1040384  }
 0x374   : > { %vm2429_vm13 = vmpackc.low %vm1771_vm10, %vm1771_vm10  ;;  %v1506_v4 = vadd.f32 %v1505_v18, %v1504_v20  ;;  %vm2085_vm10 = vcmp.gt.f32.partialorder (!%p2439_p8), %v3930_v51, 0.0 }
 0x375   : > { %2430 = vmatmul.mubr.msk.bf16.vlgmr.msra.gmra.mrb[8].mxu0 %vm2429_vm13, %v3119_v57  ;;  %vm1690_vm1 = vmand %vm1669_vm7, %vm1682_vm4  ;;  %vm1985_vm7 = vcmask 64512   ;;  %vm1596_vm4 = vcmp.eq.s32.totalorder %v3628_v6, 1  ;;  %vm3121_vm13 = vmmov (!%p2439_p8), 0  }
 0x376   : > { %vm1752_vm2 = vmand %vm1690_vm1, %vm1744_vm8  ;;  %v1520_v22 = vmax.f32 %v1506_v4, 1e-16  ;;  %vm4385_vm8 = vnez %v4365_v24  ;;  %vm4387_vm1 = vnez %v4367_v25 }
 0x377   : > { %vm1773_vm5 = vmand %vm1752_vm2, %vm1765_vm15  ;;  %vm4394_vm15 = vcmask (!%p2439_p8), 130048  }
 0x378   : > { %vm2437_vm14 = vmpackc.low %vm1773_vm5, %vm1773_vm5  ;;  %vm4386_vm5 = vnez %v4369_v26 }
 0x379   : > { %2438 = vmatmul.mubr.msk.bf16.vlgmr.msra.gmra.mrb[8].mxu1 %vm2437_vm14, %v3119_v57  ;;  %v1470_v57 = vrot.slane %v1469_v23, 1  ;;  %vm4395_vm2 = vmmov (!%p2439_p8), %vm4394_vm15 }
 0x37b   : > { %v1471_v54 = vadd.f32 %v1470_v57, %v1469_v23 }
 0x37d   : > { %v1515_v8 = vmax.f32 %v1471_v54, 1e-16 }
 0x37f   : > { %2714 = vrsqrt.f32 %v1515_v8 }
 0x380   : > { %2716 = vrsqrt.f32 %v1517_v13 }
 0x381   : > { %2718 = vrsqrt.f32 %v1514_v19 }
 0x382   : > { %2720 = vrsqrt.f32 %v1516_v15 }
 0x383   : > { %2722 = vrsqrt.f32 %v1519_v12 }
 0x384   : > { %2724 = vrsqrt.f32 %v1521_v5 }
 0x385   : > { %2726 = vrsqrt.f32 %v1518_v14 }
 0x386   : > { %2728 = vrsqrt.f32 %v1520_v22 }
 0x389   : > { %v2715_v27 = vpop.eup %2714 }
 0x38a   : > { %v2717_v57 = vpop.eup %2716 }
 0x38b   : > { %v2719_v35 = vpop.eup %2718 }
 0x38c   : > { %v2721_v54 = vpop.eup %2720 }
 0x38d   : > { %v2723_v11 = vpop.eup %2722 }
 0x38e   : > { %v2725_v29 = vpop.eup %2724 }
 0x38f   : > { %v2727_v4 = vpop.eup %2726 }
 0x41f   : > { %v1168_v37 = vpop.f32.mrb[0].mxu0  ;;  %v1239_v32 = vpop.f32.mrb[0].mxu1 }
 0x420   : > { %v1386_v33 = vsel %vm4385_vm8, %v1168_v37, 0.0  ;;  %v1388_v36 = vsel %vm4386_vm5, %v1239_v32, 0.0  ;;  %v1170_v38 = vpop.f32.mrb[1].mxu0  ;;  %v1241_v43 = vpop.f32.mrb[1].mxu1  ;;  %vm2070_vm5 = vcmp.eq.s32.totalorder (!%p2439_p8), %v3628_v6, 0 }
 0x421   : > { %v1394_v44 = vrot.slane %v1386_v33, 4  ;;  %v1406_v61 = vrot.slane %v1388_v36, 4  ;;  %v1387_v62 = vsel %vm4387_vm1, %v1170_v38, 0.0  ;;  %v1389_v46 = vsel %vm4388_vm0, %v1241_v43, 0.0  ;;  %v2729_v32 = vpop.eup %2728 }
 0x422   : > { %v1400_v49 = vrot.slane %v1387_v62, 4  ;;  %v1412_v17 = vrot.slane %v1389_v46, 4 }
 0x423   : > { %v1395_v52 = vadd.f32 %v1394_v44, %v1386_v33  ;;  %v1407_v1 = vadd.f32 %v1406_v61, %v1388_v36  ;;  %v1310_v24 = vpop.f32.mrb[2].mxu0  ;;  %v1381_v40 = vpop.f32.mrb[2].mxu1 }
 0x424   : > { %v1401_v26 = vadd.f32 %v1400_v49, %v1387_v62  ;;  %v1413_v23 = vadd.f32 %v1412_v17, %v1389_v46  ;;  %v1390_v34 = vsel %vm4389_vm11, %v1310_v24, 0.0  ;;  %v1392_v25 = vsel %vm4390_vm12, %v1381_v40, 0.0  ;;  %v1312_v63 = vpop.f32.mrb[3].mxu0  ;;  %v1383_v58 = vpop.f32.mrb[3].mxu1 }
 0x425   : > { %v1396_v41 = vrot.slane %v1395_v52, 2  ;;  %v1408_v60 = vrot.slane %v1407_v1, 2  ;;  %v1418_v47 = vrot.slane %v1390_v34, 4  ;;  %v1430_v39 = vrot.slane %v1392_v25, 4 }
 0x426   : > { %v1402_v55 = vrot.slane %v1401_v26, 2  ;;  %v1414_v48 = vrot.slane %v1413_v23, 2  ;;  %v1391_v2 = vsel %vm4391_vm9, %v1312_v63, 0.0  ;;  %v1393_v28 = vsel %vm4392_vm6, %v1383_v58, 0.0 }
 0x427   : > { %v1397_v45 = vadd.f32 %v1396_v41, %v1395_v52  ;;  %v1409_v30 = vadd.f32 %v1408_v60, %v1407_v1  ;;  %v1419_v59 = vadd.f32 %v1418_v47, %v1390_v34  ;;  %v1431_v7 = vadd.f32 %v1430_v39, %v1392_v25 }
 0x428   : > { %v1403_v50 = vadd.f32 %v1402_v55, %v1401_v26  ;;  %v1415_v20 = vadd.f32 %v1414_v48, %v1413_v23  ;;  %v1424_v53 = vrot.slane %v1391_v2, 4  ;;  %v1436_v9 = vrot.slane %v1393_v28, 4 }
 0x429   : > { %v1398_v42 = vrot.slane %v1397_v45, 1  ;;  %v1410_v16 = vrot.slane %v1409_v30, 1  ;;  %v1420_v8 = vrot.slane %v1419_v59, 2  ;;  %v1432_v10 = vrot.slane %v1431_v7, 2 }
 0x42a   : > { %v1404_v18 = vrot.slane %v1403_v50, 1  ;;  %v1416_v13 = vrot.slane %v1415_v20, 1  ;;  %v1425_v31 = vadd.f32 %v1424_v53, %v1391_v2  ;;  %v1437_v56 = vadd.f32 %v1436_v9, %v1393_v28 }
 0x42b   : > { %v1399_v19 = vadd.f32 %v1398_v42, %v1397_v45  ;;  %v1411_v15 = vadd.f32 %v1410_v16, %v1409_v30  ;;  %v1421_v21 = vadd.f32 %v1420_v8, %v1419_v59  ;;  %v1433_v12 = vadd.f32 %v1432_v10, %v1431_v7 }
 0x42c   : > { %v1405_v5 = vadd.f32 %v1404_v18, %v1403_v50  ;;  %v1417_v14 = vadd.f32 %v1416_v13, %v1415_v20  ;;  %v1426_v22 = vrot.slane %v1425_v31, 2  ;;  %v1438_v37 = vrot.slane %v1437_v56, 2 }
 0x42d   : > { %v1530_v33 = vmul.f32 %v2719_v35, %v1399_v19  ;;  %v1532_v36 = vmul.f32 %v2721_v54, %v1411_v15  ;;  %v1422_v38 = vrot.slane %v1421_v21, 1  ;;  %v1434_v43 = vrot.slane %v1433_v12, 1 }
 0x42e   : > { %v1531_v44 = vmul.f32 %v2715_v27, %v1405_v5  ;;  %v1533_v61 = vmul.f32 %v2717_v57, %v1417_v14  ;;  %v1427_v62 = vadd.f32 %v1426_v22, %v1425_v31  ;;  %v1439_v46 = vadd.f32 %v1438_v37, %v1437_v56 }
 0x42f   : > { %v1538_v49 = vsub.f32 1.0, %v1530_v33  ;;  %v1540_v17 = vsub.f32 1.0, %v1532_v36  ;;  %v1423_v52 = vadd.f32 %v1422_v38, %v1421_v21  ;;  %v1435_v1 = vadd.f32 %v1434_v43, %v1433_v12 }
 0x430   : > { %v1539_v24 = vsub.f32 1.0, %v1531_v44  ;;  %v1541_v40 = vsub.f32 1.0, %v1533_v61  ;;  %v1428_v26 = vrot.slane %v1427_v62, 1  ;;  %v1440_v23 = vrot.slane %v1439_v46, 1 }
 0x431   : > { %v1546_v34 = vmul.f32 1.442695, %v1538_v49  ;;  %v1550_v25 = vmul.f32 1.442695, %v1540_v17  ;;  %v1534_v63 = vmul.f32 %v2727_v4, %v1423_v52  ;;  %v1536_v58 = vmul.f32 %v2729_v32, %v1435_v1 }
 0x432   : > { %v1548_v41 = vmul.f32 1.442695, %v1539_v24  ;;  %v1552_v60 = vmul.f32 1.442695, %v1541_v40  ;;  %v1429_v47 = vadd.f32 %v1428_v26, %v1427_v62  ;;  %v1441_v39 = vadd.f32 %v1440_v23, %v1439_v46 }
 0x433   : > { %2730 = vpow2.f32 %v1546_v34  ;;  %v1542_v27 = vsub.f32 1.0, %v1534_v63  ;;  %v1544_v57 = vsub.f32 1.0, %v1536_v58  ;;  %v1823_v58 = vld [vmem:[#allocation8] sm:$0xff] }
 0x434   : > { %2732 = vpow2.f32 %v1550_v25  ;;  %v1535_v55 = vmul.f32 %v2723_v11, %v1429_v47  ;;  %v1537_v48 = vmul.f32 %v2725_v29, %v1441_v39  ;;  %v1858_v61 = vpop.f32.mrb[4].mxu0 }
 0x435   : > { %2734 = vpow2.f32 %v1548_v41  ;;  %v1554_v2 = vmul.f32 1.442695, %v1542_v27  ;;  %v1558_v45 = vmul.f32 1.442695, %v1544_v57  ;;  %v1860_v62 = vpop.f32.mrb[5].mxu0 }
 0x436   : > { %2736 = vpow2.f32 %v1552_v60  ;;  %v1543_v28 = vsub.f32 1.0, %v1535_v55  ;;  %v1545_v35 = vsub.f32 1.0, %v1537_v48  ;;  %v1861_v46 = vpop.f32.mrb[6].mxu0 }
 0x437   : > { %2738 = vpow2.f32 %v1554_v2  ;;  %v1862_v49 = vpop.f32.mrb[7].mxu0 }
 0x438   : > { %v1556_v30 = vmul.f32 1.442695, %v1543_v28  ;;  %v1560_v59 = vmul.f32 1.442695, %v1545_v35  ;;  %v1898_v17 = vpop.f32.mrb[4].mxu1 }
 0x439   : > { %v1899_v52 = vadd.f32 %v1898_v17, %v1858_v61  ;;  %v1900_v1 = vpop.f32.mrb[5].mxu1 }
 0x43a   : > { %2740 = vpow2.f32 %v1556_v30  ;;  %v1901_v24 = vpop.f32.mrb[6].mxu1 }
 0x43b   : > { %2742 = vpow2.f32 %v1558_v45  ;;  %v1902_v40 = vpop.f32.mrb[7].mxu1 }
 0x43c   : > { %2744 = vpow2.f32 %v1560_v59  ;;  %v1595_v59 = vld [vmem:[%s3616_s15] sm:$0xff] }
 0x43d   : > { %v2731_v7 = vpop.eup %2730 }
 0x43e   : > { %v2733_v54 = vpop.eup %2732  ;;  %v2381_v50 = vadd.f32 -1.0, %v2731_v7 }
 0x43f   : > { %v2735_v20 = vpop.eup %2734  ;;  %v2383_v11 = vadd.f32 -1.0, %v2733_v54 }
 0x440   : > { %v2737_v53 = vpop.eup %2736  ;;  %v1571_v9 = vsel %vm1570_vm3, %v2381_v50, 0.0  ;;  %v2382_v42 = vadd.f32 -1.0, %v2735_v20  ;;  %v3120_v20 = vmov (!%p2439_p8), 0.0  }
 0x441   : > { %v2739_v16 = vpop.eup %2738  ;;  %v2384_v10 = vadd.f32 -1.0, %v2737_v53  ;;  %v1574_v31 = vsel %vm1570_vm3, %v2383_v11, 0.0  ;;  %2450 = vmatprep.subr.mxu0 (!%p2439_p8), %v3120_v20  ;;  %2452 = vmatprep.mubr.msk.f32.mxu0 (!%p2439_p8), %vm3121_vm13, %v3120_v20  ;;  %v3122_v53 = vmov (!%p2439_p8), 0   ;;  %v2067_v11 = vand.u32 (!%p2439_p8), 127, %v478_v3 }
 0x442   : > { %v1572_v8 = vsel %vm1570_vm3, %v2382_v42, 0.0  ;;  %v2385_v13 = vadd.f32 -1.0, %v2739_v16  ;;  %2451 = vmatpush3.xpose.msk.msra.mxu0 (!%p2439_p8), %vm4394_vm15, %v3973_v0  ;;  %2746 = vset.pattern.permute.xlu0 (!%p2439_p8), %v3122_v53 }
 0x443   : > { %v1573_v29 = vadd.f32 %v1572_v8, %v1571_v9  ;;  %v1576_v21 = vsel %vm1570_vm3, %v2384_v10, 0.0  ;;  %v2087_v9 = vsel (!%p2439_p8), %vm2085_vm10, 1, %v3122_v53  ;;  %vm2076_vm14 = vcmp.eq.s32.totalorder (!%p2439_p8), %v3628_v6, %v2067_v11 }
 0x444   : > { %v2741_v18 = vpop.eup %2740  ;;  %v1578_v14 = vsel %vm1570_vm3, %v2385_v13, 0.0  ;;  %2089 = vperm.xlu0 (!%p2439_p8), %2746, %v2087_v9   ;;  %vm2071_vm1 = vcmp.eq.s32.totalorder (!%p2439_p8), %v2067_v11, 0 }
 0x445   : > { %v2743_v56 = vpop.eup %2742  ;;  %v1575_v19 = vadd.f32 %v1574_v31, %v1573_v29  ;;  %v2386_v15 = vadd.f32 -1.0, %v2741_v18  ;;  %2453 = vmatmul.mubr.msk.f32.vlgmr.msra.gmra.mrb[0].mxu0 (!%p2439_p8), %vm4395_vm2, %v3973_v0  ;;  %vm2072_vm0 = vmor (!%p2439_p8), %vm2070_vm5, %vm2071_vm1 }
 0x446   : > { %v2745_v12 = vpop.eup %2744  ;;  %v2387_v5 = vadd.f32 -1.0, %v2743_v56  ;;  %vm2074_vm11 = vmand (!%p2439_p8), %vm2070_vm5, %vm2071_vm1 }
 0x447   : > { %v1577_v4 = vadd.f32 %v1576_v21, %v1575_v19  ;;  %v2388_v37 = vadd.f32 -1.0, %v2745_v12  ;;  %v1580_v32 = vsel %vm1570_vm3, %v2386_v15, 0.0 }
 0x448   : > { %v1582_v36 = vsel %vm1570_vm3, %v2387_v5, 0.0  ;;  %v1938_v26 = vpop.f32.mrb[8].mxu0 }
 0x449   : > { %v1579_v22 = vadd.f32 %v1578_v14, %v1577_v4  ;;  %v1584_v43 = vsel %vm1570_vm3, %v2388_v37, 0.0  ;;  %v1939_v23 = vadd.f32 %v1938_v26, %v1899_v52  ;;  %v1940_v34 = vpop.f32.mrb[9].mxu0  ;;  %vm2124_vm3 = vcmp.eq.s32.totalorder (!%p2439_p8), %v3628_v6, 2 }
 0x44a   : > { %v1941_v25 = vpop.f32.mrb[10].mxu0 }
 0x44b   : > { %v1581_v33 = vadd.f32 %v1580_v32, %v1579_v22  ;;  %v1942_v63 = vpop.f32.mrb[11].mxu0 }
 0x44c   : > { %v1978_v41 = vpop.f32.mrb[8].mxu1 }
 0x44d   : > { %v1583_v38 = vadd.f32 %v1582_v36, %v1581_v33  ;;  %v1979_v60 = vadd.f32 %v1978_v41, %v1939_v23  ;;  %v1980_v47 = vpop.f32.mrb[9].mxu1 }
 0x44e   : > { %v1981_v39 = vpop.f32.mrb[10].mxu1 }
 0x44f   : > { %v1585_v44 = vadd.f32 %v1584_v43, %v1583_v38  ;;  %v1984_v27 = vadd.f32 %v1979_v60, %v1823_v58  ;;  %v1982_v57 = vpop.f32.mrb[11].mxu1 }
 0x451   : > { %1586 = vadd.xlane.f32.xlu1 %v1585_v44  ;;  %1986 = vst.msk [vmem:[#allocation8] sm:$0xff] %vm1985_vm7, %v1984_v27 }
 0x458   : > { %v2065_v42 = vld [vmem:[#allocation8] sm:$0xff] (!%p2439_p8) }
 0x459   : > { %v2077_v51 = vsel (!%p2439_p8), %vm2076_vm14, %v2065_v42, 0.0  ;;  %vm2068_vm8 = vcmp.gt.f32.partialorder (!%p2439_p8), %v2065_v42, 0.0 }
 0x45a   : > { %v2078_v16 = vsel (!%p2439_p8), %vm1985_vm7, %v2077_v51, 0.0  ;;  %v2069_v31 = vsel (!%p2439_p8), %vm2068_vm8, 1.0, %v3120_v20 }
 0x45b   : > { %v2079_v8 = vrot.slane (!%p2439_p8), %v2078_v16, 4  ;;  %v2073_v56 = vsel (!%p2439_p8), %vm2072_vm0, 0.5, %v2069_v31 }
 0x45c   : > { %v2075_v19 = vsel (!%p2439_p8), %vm2074_vm11, 0.0, %v2073_v56 }
 0x45d   : > { %v2080_v10 = vadd.f32 (!%p2439_p8), %v2079_v8, %v2078_v16 }
 0x45f   : > { %v2081_v29 = vrot.slane (!%p2439_p8), %v2080_v10, 2 }
 0x461   : > { %v2082_v18 = vadd.f32 (!%p2439_p8), %v2081_v29, %v2080_v10 }
 0x463   : > { %v2083_v13 = vrot.slane (!%p2439_p8), %v2082_v18, 1 }
 0x465   : > { %v2084_v0 = vadd.f32 (!%p2439_p8), %v2083_v13, %v2082_v18 }
 0x467   : > { %vm2086_vm12 = vcmp.gt.f32.partialorder (!%p2439_p8), %v2084_v0, 0.0 }
 0x4c3   : > { %v2090_v3 = vpop.permute.xlu0 (!%p2439_p8), %2089 }
 0x4c4   : > { %vm2091_vm9 = vcmp.eq.s32.totalorder (!%p2439_p8), %v2090_v3, 1 }
 0x4c5   : > { %vm2094_vm6 = vmand (!%p2439_p8), %vm2091_vm9, %vm2086_vm12 }
 0x4c6   : > { %v2095_v15 = vsel (!%p2439_p8), %vm2094_vm6, %v2075_v19, 0.0 }
 0x4c7   : > { %v2096_v21 = vsel (!%p2439_p8), %vm1985_vm7, %v2095_v15, 0.0 }
 0x4c8   : > { %2097 = vadd.xlane.f32.xlu0 (!%p2439_p8), %v2096_v21 }
 0x4de   : > { %v1587_v55 = vpop.xlane.xlu1 %1586 }
 0x4df   : > { %v1588_v48 = vrot.slane %v1587_v55, 4 }
 0x4e1   : > { %v1589_v2 = vadd.f32 %v1588_v48, %v1587_v55 }
 0x4e3   : > { %v1590_v28 = vrot.slane %v1589_v2, 2 }
 0x4e5   : > { %v1591_v35 = vadd.f32 %v1590_v28, %v1589_v2 }
 0x4e7   : > { %v1592_v45 = vrot.slane %v1591_v35, 1 }
 0x4e9   : > { %v1593_v30 = vadd.f32 %v1592_v45, %v1591_v35 }
 0x4eb   : > { %2489 = vpush %v1593_v30 }
 0x518   : > { %v2057_v12 = vpop.f32.mrb[0].mxu0 (!%p2439_p8) }
 0x519   : > { %v2061_v4 = vand.u32 (!%p2439_p8), 2147483647, %v2057_v12  ;;  %v2454_v5 = vpop.f32.mrb[1].mxu0 (!%p2439_p8) }
 0x51b   : > { %1990 = sbr.rel (%p2439_p8) target bundleno = 1538 (0x602), region = 76  ;;  %v2062_v14 = vmul.f32 (!%p2439_p8), 1.442695, %v2061_v4 }
 0x51c   : > { %s2490_s17 = spop %2489 }
 0x51d   : > { %v1597_v7 = vstv %s2490_s17  ;;  %2747 = vpow2.f32 (!%p2439_p8), %v2062_v14 }
 0x51e   : > { %v1598_v54 = vsel %vm1596_vm4, %v1597_v7, 0.0 }
 0x51f   : > { %v1599_v50 = vadd.f32 %v1598_v54, %v1595_v59 }
 0x521   : > { %1600 = vst [vmem:[%s3616_s15] sm:$0xff] %v1599_v50 }
 0x527   : > { %v2748_v22 = vpop.eup %2747 }
 0x528   : > { %v2442_v37 = vadd.f32 -1.0, %v2748_v22  ;;  %v2123_v25 = vld [vmem:[%s3616_s15] sm:$0xff] }
 0x52a   : > { %v2107_v32 = vmul.f32 %v2442_v37, %v2095_v15 }
 0x52c   : > { %v2108_v33 = vsel %vm1985_vm7, %v2107_v32, 0.0 }
 0x52d   : > { %2109 = vadd.xlane.f32.xlu1 %v2108_v33 }
 0x555   : > { %v2098_v36 = vpop.xlane.xlu0 %2097 }
 0x556   : > { %v2099_v38 = vrot.slane %v2098_v36, 4 }
 0x558   : > { %v2100_v43 = vadd.f32 %v2099_v38, %v2098_v36 }
 0x55a   : > { %v2101_v44 = vrot.slane %v2100_v43, 2 }
 0x55c   : > { %v2102_v61 = vadd.f32 %v2101_v44, %v2100_v43 }
 0x55e   : > { %v2103_v62 = vrot.slane %v2102_v61, 1 }
 0x560   : > { %v2104_v46 = vadd.f32 %v2103_v62, %v2102_v61 }
 0x562   : > { %2491 = vpush %v2104_v46 }
 0x593   : > { %s2492_s24 = spop %2491 }
 0x594   : > { %v2118_v49 = vstv %s2492_s24  ;;  %p2106_p7 = scmp.gt.f32.partialorder %s2492_s24, 0.0 }
 0x595   : > { %2749 = vrcp.f32 %v2118_v49 }
 0x59f   : > { %v2750_v34 = vpop.eup %2749 }
 0x5ba   : > { %v2110_v17 = vpop.xlane.xlu1 %2109 }
 0x5bb   : > { %v2111_v52 = vrot.slane %v2110_v17, 4 }
 0x5bd   : > { %v2112_v1 = vadd.f32 %v2111_v52, %v2110_v17 }
 0x5bf   : > { %v2113_v24 = vrot.slane %v2112_v1, 2 }
 0x5c1   : > { %v2114_v40 = vadd.f32 %v2113_v24, %v2112_v1 }
 0x5c3   : > { %v2115_v26 = vrot.slane %v2114_v40, 1 }
 0x5c5   : > { %v2116_v23 = vadd.f32 %v2115_v26, %v2114_v40 }
 0x5c7   : > { %2493 = vpush %v2116_v23 }
 0x5c8   : > { %2495 = vpush %v2750_v34 }
 0x5f8   : > { %s2494_s18 = spop %2493 }
 0x5f9   : > { %s2496_s12 = spop %2495 }
 0x5fa   : > { %s2121_s27 = smul.f32 %s2496_s12, %s2494_s18 }
 0x5fc   : > { %s4441_s27 = smov (!%p2106_p7, %s2121_s27), 0.0 }
 0x5fd   : > { %v2125_v63 = vstv %s4441_s27 }
 0x5fe   : > { %v2126_v58 = vsel %vm2124_vm3, %v2125_v63, 0.0 }
 0x5ff   : > { %v2127_v41 = vadd.f32 %v2126_v58, %v2123_v25 }
 0x601   : > { %2128 = vst [vmem:[%s3616_s15] sm:$0xff] %v2127_v41 }
 0x602 PF: > { %s4396_s21 = sld [smem:[#allocation32_spill]]  ;;  %s4398_s29 = sld [smem:[#allocation42_spill]] }
 0x603   : > { %s4399_s2 = sld [smem:[#allocation48_spill]]  ;;  %s2143_s22 = sshll.u32 %s3616_s15, 4  ;;  %s2144_s22 = int_to_ptr.vmem [resolvable:$true] %s2143_s22 }
 0x604   : > { %s2130_s6 = scalar_lea.sflag [#allocation11], %s445_s30  ;;  %s2901_s19 = scalar_lea.vmem %s2144_s22, 128 }
 0x605   : > { %p2902_p1 = scmp.ne.s32.totalorder %s2144_s22, %s2901_s19  ;;  %s3123_s14 = smov [#allocation18]  }
 0x606   : > { %s2905_s13 = sshll.u32 %s3123_s14, 4  ;;  %s2906_s13 = int_to_ptr.vmem [resolvable:$false] %s2905_s13 }
 0x607   : > { %s2907_s17 = scalar_lea.vmem %s2906_s13, 256  ;;  %p2908_p0 = scmp.lt.s32.totalorder %s2144_s22, %s2906_s13 }
 0x608   : > { %s2444_s4 = sshll.u32 %s4396_s21, 7  ;;  %p4400_p6 = scmp.ne.s32.totalorder %s4398_s29, 0 }
 0x609   : > { %s4160_s5 = scalar_lea.hbm %s4399_s2, %s2444_s4  ;;  %p2909_p5 = scmp.lt.s32.totalorder %s2907_s17, %s2901_s19 }
 0x60a   : > { %p2903_p13 = pnand %p2902_p1, %p4400_p6 }
 0x60b   : > { %p2910_p2 = por %p2909_p5, %p2908_p0 }
 0x60c   : > { %p2904_p11 = pneg %p2903_p13 }
 0x60e   : > { %p2911_p4 = pnand %p2910_p2, %p2904_p11 }
 0x610   : > { %2914 = shalt.err (!%p2911_p4)
}
 0x611   : > { %s2915_s30 = scalar_lea.hbm %s4160_s5, 128  ;;  %s2919_s24 = scalar_lea.hbm %s4399_s2, 256 }
 0x612   : > { %p2916_p10 = scmp.ne.s32.totalorder %s4160_s5, %s2915_s30  ;;  %p2920_p12 = scmp.lt.u32.totalorder %s4160_s5, %s4399_s2 }
 0x613   : > { %p2921_p8 = scmp.lt.u32.totalorder %s2919_s24, %s2915_s30  ;;  %p2923_p1 = scmp.lt.u32.totalorder %s2915_s30, %s4160_s5 }
 0x614   : > { %p2917_p9 = pnand %p2916_p10, %p4400_p6 }
 0x615   : > { %p2922_p7 = por %p2921_p8, %p2920_p12 }
 0x616   : > { %p2918_p3 = pneg %p2917_p9 }
 0x617   : > { %p2924_p13 = por %p2923_p1, %p2922_p7 }
 0x619   : > { %p2925_p11 = pnand %p2924_p13, %p2918_p3 }
 0x61b   : > { %2928 = shalt.err (!%p2925_p11)
}
 0x61c   : > { %2507 = dma.vmem_to_hbm [thread:$0]  (%p4400_p6), %s2144_s22, 128, %s4160_s5, %s2130_s6  }
 0x61d PF: > { %s4401_s27 = sld [smem:[#allocation24_spill]]  ;;  %s4402_s21 = sld [smem:[#allocation43_spill]] }
 0x61e   : > { %p2530_p0 = scmp.ge.s32.totalorder %s3099_s11, 2 }
 0x623   : > { %s2155_s28 = sand.u32 1, %s4401_s27   ;;  %p4403_p5 = scmp.ne.s32.totalorder %s4402_s21, 0 }
 0x624   : > { %s2156_s4 = scalar_lea.sflag [#allocation11], %s2155_s28 }
 0x625   : > { %p2526_p2 = pnand %p2530_p0, %p4403_p5 }
 0x627   : > { %3022 = dma.done.wait (!%p2526_p2), %s2156_s4, 128  }
 0x628   : > { %3024 = vsyncadd (!%p2526_p2), %s2156_s4, 4294967168  ;;  %s27_s11 = sadd.s32 1, %s3099_s11   ;;  %s4405_s18 = sld [smem:[#allocation25_spill]] }
 0x629   : > { %p4187_p4 = scmp.ge.s32.totalorder %s27_s11, 18   ;;  %s4406_s19 = sld [smem:[#allocation26_spill]] }
 0x62a   : > { %s4407_s29 = sld [smem:[#allocation41_spill]]  ;;  %s4408_s21 = sld [smem:[#allocation27_spill]] }
 0x62b   : > { %s4409_s7 = sld [smem:[#allocation39_spill]]  ;;  %s4410_s5 = smov %s3495_s20 }
 0x62c   : > { %s4411_s27 = sld [smem:[#allocation28_spill]]  ;;  %s4412_s28 = sld [smem:[#allocation29_spill]] }
 0x62d   : > { %s4413_s6 = sld [smem:[#allocation38_spill]]  ;;  %s4414_s14 = sld [smem:[#allocation33_spill]] }
 0x62e   : > { %s4415_s13 = sld [smem:[#allocation34_spill]]  ;;  %s4416_s9 = sld [smem:[#allocation35_spill]] }
 0x62f   : > { %s4417_s17 = sld [smem:[#allocation36_spill]]  ;;  %s4419_s22 = smov %s3047_s23 }
 0x630   : > { %s4418_s20 = smov %s4407_s29  ;;  %s4421_s24 = smov %s3055_s25 }
 0x631   : > { %s4420_s23 = smov %s4409_s7  ;;  %s4422_s25 = smov %s3059_s26 }
 0x632   : > { %s4423_s26 = smov %s4410_s5  ;;  %s4425_s30 = smov %s3087_s8 }
 0x633   : > { %s4424_s29 = smov %s4413_s6  ;;  %s4426_s6 = smov %s4414_s14 }
 0x634   : > { %s4427_s7 = smov %s3095_s10  ;;  %s4428_s8 = smov %s4415_s13 }
 0x635   : > { %s4429_s10 = smov %s4417_s17  ;;  %26 = sbr.rel (!%p4187_p4) target bundleno = 23 (0x17), region = 150 }
 0x63c   :  { %2161 = vsyncpa [#allocation10], 1 }
 0x63d   :  { %2163 = vsyncpa [#allocation10 + $0x1], 1 }
 0x63e   :  { %2164 = vsyncpa [#allocation13], 1 }
 0x63f   :  { %2166 = vsyncpa [#allocation13 + $0x1], 1 }
 0x640   :  { %2167 = vsyncpa [#allocation16], 1 }
 0x641   :  { %2169 = vsyncpa [#allocation16 + $0x1], 1 }
 0x642   :  { %2170 = vsyncpa [#allocation11], 1 }
 0x643   :  { %2172 = vsyncpa [#allocation11 + $0x1], 1 }

</bundles_post_ra>
